<compile_context>
chip_gen: v7x
topology: tpu7x:2x2x1
jax: 0.10.0
libtpu: 0.0.40
codegen_flags: <defaults>
</compile_context>

<pallas_src>
import functools

import jax
import jax.numpy as jnp
from jax.experimental import pallas as pl
from jax.experimental.pallas import tpu as pltpu


# ----------------------------- quantizer stubs ------------------------------
def _fatnn_act_quant(x):
    # TODO(synk): FATNN_Act_Quantizer definition not provided in the module source; pass-through.
    return x


def _esa_weight_quant(w):
    # TODO(synk): ESA_Quant weight quantizer definition not provided; pass-through.
    # TODO(synk): once real ternary weights land, route the MXU through int8 on
    #             v5e/v6e (fp8/bf16 on v7x) instead of bf16.
    return w


# ------------------------------- small utils --------------------------------
def _round_up(x, m):
    return ((x + m - 1) // m) * m


def _tap_offsets(stride):
    """Per-tap (phase_index, row_offset, col_offset) into the phase-split input."""
    taps = []
    for dy in range(3):
        for dx in range(3):
            if stride == 1:
                taps.append((0, dy, dx))
            else:  # stride == 2: phases laid out as ph = (dy % 2) * 2 + (dx % 2)
                taps.append(((dy % 2) * 2 + (dx % 2), dy // 2, dx // 2))
    return tuple(taps)


# ------------------------------ Pallas kernels ------------------------------
def _accumulate_taps(x_ref, w_ref, acc_ref, *, taps, n_phases, ho, wo):
    """acc[M, Cpad] (f32) = sum_t  x_tap_t[M, Cin] @ w[t]  (bf16 MXU, f32 acc)."""
    cin = w_ref.shape[1]
    m = ho * wo
    # Load each phase of the padded input once; every tap is a dense static slice.
    phases = [x_ref[0, p] for p in range(n_phases)]
    for t, (ph, oy, ox) in enumerate(taps):
        xs = phases[ph][oy:oy + ho, ox:ox + wo, :]          # (ho, wo, cin) bf16
        contrib = jnp.dot(xs.reshape(m, cin), w_ref[t],
                          preferred_element_type=jnp.float32)
        if t == 0:
            acc_ref[...] = contrib
        else:
            acc_ref[...] += contrib


def _conv_bn_relu_kernel(x_ref, w_ref, b_ref, o_ref, acc_ref,
                         *, taps, n_phases, ho, wo):
    # conv (9 taps) + folded-BN bias + ReLU, f32 epilogue.
    _accumulate_taps(x_ref, w_ref, acc_ref, taps=taps, n_phases=n_phases, ho=ho, wo=wo)
    cpad = w_ref.shape[2]
    y = jnp.maximum(acc_ref[...] + b_ref[...], 0.0)
    o_ref[0] = y.reshape(ho, wo, cpad).astype(o_ref.dtype)


def _conv_bn_add_relu_kernel(x_ref, w_ref, b_ref, res_ref, o_ref, acc_ref,
                             *, taps, n_phases, ho, wo):
    # conv (9 taps) + folded-BN bias + residual add + ReLU, f32 epilogue.
    _accumulate_taps(x_ref, w_ref, acc_ref, taps=taps, n_phases=n_phases, ho=ho, wo=wo)
    cpad = w_ref.shape[2]
    m = ho * wo
    res = res_ref[0].reshape(m, cpad).astype(jnp.float32)
    y = jnp.maximum(acc_ref[...] + b_ref[...] + res, 0.0)
    o_ref[0] = y.reshape(ho, wo, cpad).astype(o_ref.dtype)


def _conv3x3_bn_relu(x_phases, w_taps, bias, *, stride, ho, wo, out_dtype,
                     residual=None):
    """Fused 3x3 conv (pad=1) + folded-BN + [residual] + ReLU.

    x_phases : (N, P, Hp, Wp, Cin)   bf16   phase-split, spatially padded input
    w_taps   : (9, Cin, Cpad)        bf16   per-tap weights, BN scale folded in
    bias     : (1, Cpad)             f32    folded BN bias (zero on pad lanes)
    residual : (N, ho, wo, Cpad)     bf16   optional shortcut
    returns  : (N, ho, wo, Cpad)     out_dtype
    """
    n, n_ph, hph, wph, cin = x_phases.shape
    assert w_taps.shape[1] == cin
    cpad = w_taps.shape[2]
    taps = _tap_offsets(stride)

    in_specs = [
        pl.BlockSpec((1, n_ph, hph, wph, cin), lambda b: (b, 0, 0, 0, 0)),
        pl.BlockSpec((9, cin, cpad), lambda b: (0, 0, 0)),   # resident weights
        pl.BlockSpec((1, cpad), lambda b: (0, 0)),           # resident bias
    ]
    args = [x_phases, w_taps, bias]
    if residual is None:
        kernel = functools.partial(_conv_bn_relu_kernel,
                                   taps=taps, n_phases=n_ph, ho=ho, wo=wo)
    else:
        in_specs.append(pl.BlockSpec((1, ho, wo, cpad), lambda b: (b, 0, 0, 0)))
        args.append(residual)
        kernel = functools.partial(_conv_bn_add_relu_kernel,
                                   taps=taps, n_phases=n_ph, ho=ho, wo=wo)

    return pl.pallas_call(
        kernel,
        out_shape=jax.ShapeDtypeStruct((n, ho, wo, cpad), out_dtype),
        grid=(n,),
        in_specs=in_specs,
        out_specs=pl.BlockSpec((1, ho, wo, cpad), lambda b: (b, 0, 0, 0)),
        scratch_shapes=[pltpu.VMEM((ho * wo, cpad), jnp.float32)],
        compiler_params=pltpu.CompilerParams(dimension_semantics=("parallel",)),
    )(*args)


# ------------------------------- host-side prep -----------------------------
def _phase_split(x_nhwc, stride):
    """Spatial pad=1, then (for stride 2) split into 2x2 phases so each conv tap
    is a dense static slice in-kernel.  Returns (N, P, Hp, Wp, C), Ho, Wo."""
    n, h, w, c = x_nhwc.shape
    xp = jnp.pad(x_nhwc, ((0, 0), (1, 1), (1, 1), (0, 0)))
    ho = (h - 1) // stride + 1
    wo = (w - 1) // stride + 1
    if stride == 1:
        return xp[:, None], ho, wo                      # (N, 1, H+2, W+2, C)
    assert stride == 2, "only stride 1 / 2 supported (as in the module)"
    hp, wp = ho + 1, wo + 1
    phases = []
    for py in range(2):
        for px in range(2):
            ph = xp[:, py::2, px::2, :][:, :hp, :wp, :]
            ph = jnp.pad(ph, ((0, 0), (0, hp - ph.shape[1]),
                              (0, wp - ph.shape[2]), (0, 0)))
            phases.append(ph)
    return jnp.stack(phases, axis=1), ho, wo            # (N, 4, Hp, Wp, C)


def _fold_bn(bn, eps=1e-5):
    scale = bn["gamma"] / jnp.sqrt(bn["var"] + eps)
    bias = bn["beta"] - bn["mean"] * scale
    return scale, bias


def _prep_weight(w_oihw, bn_scale, cout_pad, cin_pad=None):
    # (Cout, Cin, 3, 3) -> (3, 3, Cin, Cout); fold BN scale into output channels
    # (in f32, before the bf16 cast); pad channels; emit per-tap (9, Cin', Cout').
    cout, cin = w_oihw.shape[0], w_oihw.shape[1]
    w = jnp.transpose(w_oihw, (2, 3, 1, 0)) * bn_scale[None, None, None, :]
    w = w.reshape(9, cin, cout)
    if cin_pad is None:
        cin_pad = cin
    w = jnp.pad(w, ((0, 0), (0, cin_pad - cin), (0, cout_pad - cout)))
    return w.astype(jnp.bfloat16)


def _prep_bias(bias, cpad):
    return jnp.pad(bias, (0, cpad - bias.shape[0])).reshape(1, cpad).astype(jnp.float32)


def init_basic_block_params(key, in_planes, planes):
    k1, k2, k3, k4, k5, k6 = jax.random.split(key, 6)
    return {
        "w1": jax.random.normal(k1, (planes, in_planes, 3, 3), jnp.float32) * 0.1,
        "w2": jax.random.normal(k2, (planes, planes, 3, 3), jnp.float32) * 0.1,
        "bn1": {
            "gamma": jax.random.uniform(k3, (planes,), jnp.float32, 0.5, 1.5),
            "beta": jax.random.normal(k4, (planes,), jnp.float32) * 0.1,
            "mean": jnp.zeros((planes,), jnp.float32),
            "var": jnp.ones((planes,), jnp.float32),
        },
        "bn2": {
            "gamma": jax.random.uniform(k5, (planes,), jnp.float32, 0.5, 1.5),
            "beta": jax.random.normal(k6, (planes,), jnp.float32) * 0.1,
            "mean": jnp.zeros((planes,), jnp.float32),
            "var": jnp.ones((planes,), jnp.float32),
        },
    }


def basic_block_forward(x_nchw, params, *, in_planes, planes, stride):
    # NCHW -> NHWC once at the block boundary.
    # TODO(synk): in a full network keep NHWC (and the 128-padded channels)
    #             end-to-end and drop these boundary transposes / the final slice.
    x = jnp.transpose(x_nchw, (0, 2, 3, 1)).astype(jnp.float32)
    cpad = _round_up(planes, 128)

    # --- act0 -> conv1 (+ folded bn1) -> relu1 -------------------------------
    xq = _fatnn_act_quant(x)
    s1, b1 = _fold_bn(params["bn1"])
    w1 = _prep_weight(_esa_weight_quant(params["w1"]), s1, cpad)
    bias1 = _prep_bias(b1, cpad)
    x_ph, ho, wo = _phase_split(xq.astype(jnp.bfloat16), stride)
    y1 = _conv3x3_bn_relu(x_ph, w1, bias1, stride=stride, ho=ho, wo=wo,
                          out_dtype=jnp.bfloat16)        # (N, ho, wo, cpad) bf16

    # --- act1 -> conv2 (+ folded bn2) -> +shortcut -> relu2 ------------------
    y1q = _fatnn_act_quant(y1)
    s2, b2 = _fold_bn(params["bn2"])
    w2 = _prep_weight(_esa_weight_quant(params["w2"]), s2, cpad, cin_pad=cpad)
    bias2 = _prep_bias(b2, cpad)
    y_ph, ho2, wo2 = _phase_split(y1q, 1)

    # shortcut (channel-padded directly to cpad so it adds lane-aligned in-kernel)
    if stride != 1 or in_planes != planes:
        sc = x[:, ::2, ::2, :]
        front = planes // 4
        sc = jnp.pad(sc, ((0, 0), (0, 0), (0, 0),
                          (front, cpad - in_planes - front)))
    else:
        sc = jnp.pad(x, ((0, 0), (0, 0), (0, 0), (0, cpad - in_planes)))
    res = sc.astype(jnp.bfloat16)

    out = _conv3x3_bn_relu(y_ph, w2, bias2, stride=1, ho=ho2, wo=wo2,
                           out_dtype=jnp.float32, residual=res)
    out = out[..., :planes]
    return jnp.transpose(out, (0, 3, 1, 2))              # NHWC -> NCHW


# --------------------------- plain-JAX reference ----------------------------
def _reference(x_nchw, params, *, in_planes, planes, stride, eps=1e-5):
    def conv(x, w, s):
        return jax.lax.conv_general_dilated(
            x, w, window_strides=(s, s), padding=((1, 1), (1, 1)),
            dimension_numbers=("NCHW", "OIHW", "NCHW"))

    def bn(x, p):
        sc = p["gamma"] / jnp.sqrt(p["var"] + eps)
        b = p["beta"] - p["mean"] * sc
        return x * sc[None, :, None, None] + b[None, :, None, None]

    out = jnp.maximum(bn(conv(x_nchw, params["w1"], stride), params["bn1"]), 0.0)
    out = bn(conv(out, params["w2"], 1), params["bn2"])
    if stride != 1 or in_planes != planes:
        sc = x_nchw[:, :, ::2, ::2]
        pad = planes // 4
        sc = jnp.pad(sc, ((0, 0), (pad, pad), (0, 0), (0, 0)))
    else:
        sc = x_nchw
    return jnp.maximum(out + sc, 0.0)


if __name__ == "__main__":
    key = jax.random.PRNGKey(0)
    configs = [
        dict(in_planes=4, planes=8, stride=2, hw=16),   # downsample shortcut path
        dict(in_planes=8, planes=8, stride=1, hw=8),    # identity shortcut path
    ]
    for cfg in configs:
        key, kx, kp = jax.random.split(key, 3)
        x = jax.random.normal(kx, (2, cfg["in_planes"], cfg["hw"], cfg["hw"]),
                              jnp.float32)
        params = init_basic_block_params(kp, cfg["in_planes"], cfg["planes"])

        fwd = functools.partial(basic_block_forward, in_planes=cfg["in_planes"],
                                planes=cfg["planes"], stride=cfg["stride"])
        out = jax.block_until_ready(jax.jit(fwd)(x, params))

        ref = _reference(x, params, in_planes=cfg["in_planes"],
                         planes=cfg["planes"], stride=cfg["stride"])
        ho = (cfg["hw"] - 1) // cfg["stride"] + 1
        assert out.shape == (2, cfg["planes"], ho, ho), out.shape
        # bf16 MXU operands + bf16 intermediate -> compare against the pure-f32
        # reference with a tolerance that covers bf16 rounding (~1-2% relative).
        assert jnp.allclose(out, ref, rtol=5e-2, atol=5e-2), (
            "mismatch vs reference; max abs err = "
            + str(float(jnp.max(jnp.abs(out - ref)))))
    print("KERNEL_OK")
</pallas_src>

<mosaic_0001>
module attributes {stable_mosaic.version = 11 : i64} {
  func.func @_conv_bn_relu_kernel(%arg0: i32, %arg1: memref<1x4x9x9x4xbf16, #tpu.memory_space<vmem>>, %arg2: memref<9x4x128xbf16, #tpu.memory_space<vmem>>, %arg3: memref<1x128xf32, #tpu.memory_space<vmem>>, %arg4: memref<1x8x8x128xbf16, #tpu.memory_space<vmem>>, %arg5: memref<64x128xf32, #tpu.memory_space<vmem>>) attributes {dimension_semantics = [#tpu.dimension_semantics<parallel>], iteration_bounds = array<i64: 2>, scalar_prefetch = 0 : i64, scratch_operands = 1 : i64, tpu.core_type = #tpu.core_type<tc>, window_params = [{transform_indices = @transform_0, window_bounds = array<i64: 1, 4, 9, 9, 4>}, {pipeline_mode = #tpu.pipeline_mode<synchronous>, transform_indices = @transform_1, window_bounds = array<i64: 9, 4, 128>}, {pipeline_mode = #tpu.pipeline_mode<synchronous>, transform_indices = @transform_2, window_bounds = array<i64: 1, 128>}, {transform_indices = @transform_3, window_bounds = array<i64: 1, 8, 8, 128>}]} {
    %c0 = arith.constant 0 : index
    %c0_0 = arith.constant 0 : index
    %c0_1 = arith.constant 0 : index
    %c0_2 = arith.constant 0 : index
    %c0_3 = arith.constant 0 : index
    %0 = vector.load %arg1[%c0, %c0_0, %c0_1, %c0_2, %c0_3] : memref<1x4x9x9x4xbf16, #tpu.memory_space<vmem>>, vector<1x1x9x9x4xbf16>
    %1 = vector.shape_cast %0 : vector<1x1x9x9x4xbf16> to vector<9x9x4xbf16>
    %c0_4 = arith.constant 0 : index
    %c1 = arith.constant 1 : index
    %c0_5 = arith.constant 0 : index
    %c0_6 = arith.constant 0 : index
    %c0_7 = arith.constant 0 : index
    %2 = vector.load %arg1[%c0_4, %c1, %c0_5, %c0_6, %c0_7] : memref<1x4x9x9x4xbf16, #tpu.memory_space<vmem>>, vector<1x1x9x9x4xbf16>
    %3 = vector.shape_cast %2 : vector<1x1x9x9x4xbf16> to vector<9x9x4xbf16>
    %c0_8 = arith.constant 0 : index
    %c2 = arith.constant 2 : index
    %c0_9 = arith.constant 0 : index
    %c0_10 = arith.constant 0 : index
    %c0_11 = arith.constant 0 : index
    %4 = vector.load %arg1[%c0_8, %c2, %c0_9, %c0_10, %c0_11] : memref<1x4x9x9x4xbf16, #tpu.memory_space<vmem>>, vector<1x1x9x9x4xbf16>
    %5 = vector.shape_cast %4 : vector<1x1x9x9x4xbf16> to vector<9x9x4xbf16>
    %c0_12 = arith.constant 0 : index
    %c3 = arith.constant 3 : index
    %c0_13 = arith.constant 0 : index
    %c0_14 = arith.constant 0 : index
    %c0_15 = arith.constant 0 : index
    %6 = vector.load %arg1[%c0_12, %c3, %c0_13, %c0_14, %c0_15] : memref<1x4x9x9x4xbf16, #tpu.memory_space<vmem>>, vector<1x1x9x9x4xbf16>
    %7 = vector.shape_cast %6 : vector<1x1x9x9x4xbf16> to vector<9x9x4xbf16>
    %8 = vector.extract_strided_slice %1 {offsets = [0, 0, 0], sizes = [8, 8, 4], strides = [1, 1, 1]} : vector<9x9x4xbf16> to vector<8x8x4xbf16>
    %9 = vector.shape_cast %8 : vector<8x8x4xbf16> to vector<64x4xbf16>
    %c0_16 = arith.constant 0 : index
    %c0_17 = arith.constant 0 : index
    %c0_18 = arith.constant 0 : index
    %10 = vector.load %arg2[%c0_16, %c0_17, %c0_18] : memref<9x4x128xbf16, #tpu.memory_space<vmem>>, vector<1x4x128xbf16>
    %11 = vector.shape_cast %10 : vector<1x4x128xbf16> to vector<4x128xbf16>
    %cst = arith.constant dense<0.000000e+00> : vector<64x128xf32>
    %12 = tpu.matmul %9, %11, %cst {dimension_numbers = #tpu.dot_dimension_numbers<[1], [0], [0], [1], [0, 0, 1, 1], [], []>} : vector<64x4xbf16>, vector<4x128xbf16>, vector<64x128xf32> -> vector<64x128xf32>
    %c0_19 = arith.constant 0 : index
    %c0_20 = arith.constant 0 : index
    %13 = vector.load %arg5[%c0_19, %c0_20] : memref<64x128xf32, #tpu.memory_space<vmem>>, vector<64x128xf32>
    tpu.vector_store %arg5[%c0_19, %c0_20], %12 {strides = array<i32>} : memref<64x128xf32, #tpu.memory_space<vmem>>, vector<64x128xf32>,
    %14 = vector.extract_strided_slice %3 {offsets = [0, 0, 0], sizes = [8, 8, 4], strides = [1, 1, 1]} : vector<9x9x4xbf16> to vector<8x8x4xbf16>
    %15 = vector.shape_cast %14 : vector<8x8x4xbf16> to vector<64x4xbf16>
    %c1_21 = arith.constant 1 : index
    %c0_22 = arith.constant 0 : index
    %c0_23 = arith.constant 0 : index
    %16 = vector.load %arg2[%c1_21, %c0_22, %c0_23] : memref<9x4x128xbf16, #tpu.memory_space<vmem>>, vector<1x4x128xbf16>
    %17 = vector.shape_cast %16 : vector<1x4x128xbf16> to vector<4x128xbf16>
    %cst_24 = arith.constant dense<0.000000e+00> : vector<64x128xf32>
    %18 = tpu.matmul %15, %17, %cst_24 {dimension_numbers = #tpu.dot_dimension_numbers<[1], [0], [0], [1], [0, 0, 1, 1], [], []>} : vector<64x4xbf16>, vector<4x128xbf16>, vector<64x128xf32> -> vector<64x128xf32>
    %c0_25 = arith.constant 0 : index
    %c0_26 = arith.constant 0 : index
    %19 = vector.load %arg5[%c0_25, %c0_26] : memref<64x128xf32, #tpu.memory_space<vmem>>, vector<64x128xf32>
    %20 = arith.addf %19, %18 : vector<64x128xf32>
    %c0_27 = arith.constant 0 : index
    %c0_28 = arith.constant 0 : index
    %21 = vector.load %arg5[%c0_27, %c0_28] : memref<64x128xf32, #tpu.memory_space<vmem>>, vector<64x128xf32>
    tpu.vector_store %arg5[%c0_27, %c0_28], %20 {strides = array<i32>} : memref<64x128xf32, #tpu.memory_space<vmem>>, vector<64x128xf32>,
    %22 = vector.extract_strided_slice %1 {offsets = [0, 1, 0], sizes = [8, 8, 4], strides = [1, 1, 1]} : vector<9x9x4xbf16> to vector<8x8x4xbf16>
    %23 = vector.shape_cast %22 : vector<8x8x4xbf16> to vector<64x4xbf16>
    %c2_29 = arith.constant 2 : index
    %c0_30 = arith.constant 0 : index
    %c0_31 = arith.constant 0 : index
    %24 = vector.load %arg2[%c2_29, %c0_30, %c0_31] : memref<9x4x128xbf16, #tpu.memory_space<vmem>>, vector<1x4x128xbf16>
    %25 = vector.shape_cast %24 : vector<1x4x128xbf16> to vector<4x128xbf16>
    %cst_32 = arith.constant dense<0.000000e+00> : vector<64x128xf32>
    %26 = tpu.matmul %23, %25, %cst_32 {dimension_numbers = #tpu.dot_dimension_numbers<[1], [0], [0], [1], [0, 0, 1, 1], [], []>} : vector<64x4xbf16>, vector<4x128xbf16>, vector<64x128xf32> -> vector<64x128xf32>
    %c0_33 = arith.constant 0 : index
    %c0_34 = arith.constant 0 : index
    %27 = vector.load %arg5[%c0_33, %c0_34] : memref<64x128xf32, #tpu.memory_space<vmem>>, vector<64x128xf32>
    %28 = arith.addf %27, %26 : vector<64x128xf32>
    %c0_35 = arith.constant 0 : index
    %c0_36 = arith.constant 0 : index
    %29 = vector.load %arg5[%c0_35, %c0_36] : memref<64x128xf32, #tpu.memory_space<vmem>>, vector<64x128xf32>
    tpu.vector_store %arg5[%c0_35, %c0_36], %28 {strides = array<i32>} : memref<64x128xf32, #tpu.memory_space<vmem>>, vector<64x128xf32>,
    %30 = vector.extract_strided_slice %5 {offsets = [0, 0, 0], sizes = [8, 8, 4], strides = [1, 1, 1]} : vector<9x9x4xbf16> to vector<8x8x4xbf16>
    %31 = vector.shape_cast %30 : vector<8x8x4xbf16> to vector<64x4xbf16>
    %c3_37 = arith.constant 3 : index
    %c0_38 = arith.constant 0 : index
    %c0_39 = arith.constant 0 : index
    %32 = vector.load %arg2[%c3_37, %c0_38, %c0_39] : memref<9x4x128xbf16, #tpu.memory_space<vmem>>, vector<1x4x128xbf16>
    %33 = vector.shape_cast %32 : vector<1x4x128xbf16> to vector<4x128xbf16>
    %cst_40 = arith.constant dense<0.000000e+00> : vector<64x128xf32>
    %34 = tpu.matmul %31, %33, %cst_40 {dimension_numbers = #tpu.dot_dimension_numbers<[1], [0], [0], [1], [0, 0, 1, 1], [], []>} : vector<64x4xbf16>, vector<4x128xbf16>, vector<64x128xf32> -> vector<64x128xf32>
    %c0_41 = arith.constant 0 : index
    %c0_42 = arith.constant 0 : index
    %35 = vector.load %arg5[%c0_41, %c0_42] : memref<64x128xf32, #tpu.memory_space<vmem>>, vector<64x128xf32>
    %36 = arith.addf %35, %34 : vector<64x128xf32>
    %c0_43 = arith.constant 0 : index
    %c0_44 = arith.constant 0 : index
    %37 = vector.load %arg5[%c0_43, %c0_44] : memref<64x128xf32, #tpu.memory_space<vmem>>, vector<64x128xf32>
    tpu.vector_store %arg5[%c0_43, %c0_44], %36 {strides = array<i32>} : memref<64x128xf32, #tpu.memory_space<vmem>>, vector<64x128xf32>,
    %38 = vector.extract_strided_slice %7 {offsets = [0, 0, 0], sizes = [8, 8, 4], strides = [1, 1, 1]} : vector<9x9x4xbf16> to vector<8x8x4xbf16>
    %39 = vector.shape_cast %38 : vector<8x8x4xbf16> to vector<64x4xbf16>
    %c4 = arith.constant 4 : index
    %c0_45 = arith.constant 0 : index
    %c0_46 = arith.constant 0 : index
    %40 = vector.load %arg2[%c4, %c0_45, %c0_46] : memref<9x4x128xbf16, #tpu.memory_space<vmem>>, vector<1x4x128xbf16>
    %41 = vector.shape_cast %40 : vector<1x4x128xbf16> to vector<4x128xbf16>
    %cst_47 = arith.constant dense<0.000000e+00> : vector<64x128xf32>
    %42 = tpu.matmul %39, %41, %cst_47 {dimension_numbers = #tpu.dot_dimension_numbers<[1], [0], [0], [1], [0, 0, 1, 1], [], []>} : vector<64x4xbf16>, vector<4x128xbf16>, vector<64x128xf32> -> vector<64x128xf32>
    %c0_48 = arith.constant 0 : index
    %c0_49 = arith.constant 0 : index
    %43 = vector.load %arg5[%c0_48, %c0_49] : memref<64x128xf32, #tpu.memory_space<vmem>>, vector<64x128xf32>
    %44 = arith.addf %43, %42 : vector<64x128xf32>
    %c0_50 = arith.constant 0 : index
    %c0_51 = arith.constant 0 : index
    %45 = vector.load %arg5[%c0_50, %c0_51] : memref<64x128xf32, #tpu.memory_space<vmem>>, vector<64x128xf32>
    tpu.vector_store %arg5[%c0_50, %c0_51], %44 {strides = array<i32>} : memref<64x128xf32, #tpu.memory_space<vmem>>, vector<64x128xf32>,
    %46 = vector.extract_strided_slice %5 {offsets = [0, 1, 0], sizes = [8, 8, 4], strides = [1, 1, 1]} : vector<9x9x4xbf16> to vector<8x8x4xbf16>
    %47 = vector.shape_cast %46 : vector<8x8x4xbf16> to vector<64x4xbf16>
    %c5 = arith.constant 5 : index
    %c0_52 = arith.constant 0 : index
    %c0_53 = arith.constant 0 : index
    %48 = vector.load %arg2[%c5, %c0_52, %c0_53] : memref<9x4x128xbf16, #tpu.memory_space<vmem>>, vector<1x4x128xbf16>
    %49 = vector.shape_cast %48 : vector<1x4x128xbf16> to vector<4x128xbf16>
    %cst_54 = arith.constant dense<0.000000e+00> : vector<64x128xf32>
    %50 = tpu.matmul %47, %49, %cst_54 {dimension_numbers = #tpu.dot_dimension_numbers<[1], [0], [0], [1], [0, 0, 1, 1], [], []>} : vector<64x4xbf16>, vector<4x128xbf16>, vector<64x128xf32> -> vector<64x128xf32>
    %c0_55 = arith.constant 0 : index
    %c0_56 = arith.constant 0 : index
    %51 = vector.load %arg5[%c0_55, %c0_56] : memref<64x128xf32, #tpu.memory_space<vmem>>, vector<64x128xf32>
    %52 = arith.addf %51, %50 : vector<64x128xf32>
    %c0_57 = arith.constant 0 : index
    %c0_58 = arith.constant 0 : index
    %53 = vector.load %arg5[%c0_57, %c0_58] : memref<64x128xf32, #tpu.memory_space<vmem>>, vector<64x128xf32>
    tpu.vector_store %arg5[%c0_57, %c0_58], %52 {strides = array<i32>} : memref<64x128xf32, #tpu.memory_space<vmem>>, vector<64x128xf32>,
    %54 = vector.extract_strided_slice %1 {offsets = [1, 0, 0], sizes = [8, 8, 4], strides = [1, 1, 1]} : vector<9x9x4xbf16> to vector<8x8x4xbf16>
    %55 = vector.shape_cast %54 : vector<8x8x4xbf16> to vector<64x4xbf16>
    %c6 = arith.constant 6 : index
    %c0_59 = arith.constant 0 : index
    %c0_60 = arith.constant 0 : index
    %56 = vector.load %arg2[%c6, %c0_59, %c0_60] : memref<9x4x128xbf16, #tpu.memory_space<vmem>>, vector<1x4x128xbf16>
    %57 = vector.shape_cast %56 : vector<1x4x128xbf16> to vector<4x128xbf16>
    %cst_61 = arith.constant dense<0.000000e+00> : vector<64x128xf32>
    %58 = tpu.matmul %55, %57, %cst_61 {dimension_numbers = #tpu.dot_dimension_numbers<[1], [0], [0], [1], [0, 0, 1, 1], [], []>} : vector<64x4xbf16>, vector<4x128xbf16>, vector<64x128xf32> -> vector<64x128xf32>
    %c0_62 = arith.constant 0 : index
    %c0_63 = arith.constant 0 : index
    %59 = vector.load %arg5[%c0_62, %c0_63] : memref<64x128xf32, #tpu.memory_space<vmem>>, vector<64x128xf32>
    %60 = arith.addf %59, %58 : vector<64x128xf32>
    %c0_64 = arith.constant 0 : index
    %c0_65 = arith.constant 0 : index
    %61 = vector.load %arg5[%c0_64, %c0_65] : memref<64x128xf32, #tpu.memory_space<vmem>>, vector<64x128xf32>
    tpu.vector_store %arg5[%c0_64, %c0_65], %60 {strides = array<i32>} : memref<64x128xf32, #tpu.memory_space<vmem>>, vector<64x128xf32>,
    %62 = vector.extract_strided_slice %3 {offsets = [1, 0, 0], sizes = [8, 8, 4], strides = [1, 1, 1]} : vector<9x9x4xbf16> to vector<8x8x4xbf16>
    %63 = vector.shape_cast %62 : vector<8x8x4xbf16> to vector<64x4xbf16>
    %c7 = arith.constant 7 : index
    %c0_66 = arith.constant 0 : index
    %c0_67 = arith.constant 0 : index
    %64 = vector.load %arg2[%c7, %c0_66, %c0_67] : memref<9x4x128xbf16, #tpu.memory_space<vmem>>, vector<1x4x128xbf16>
    %65 = vector.shape_cast %64 : vector<1x4x128xbf16> to vector<4x128xbf16>
    %cst_68 = arith.constant dense<0.000000e+00> : vector<64x128xf32>
    %66 = tpu.matmul %63, %65, %cst_68 {dimension_numbers = #tpu.dot_dimension_numbers<[1], [0], [0], [1], [0, 0, 1, 1], [], []>} : vector<64x4xbf16>, vector<4x128xbf16>, vector<64x128xf32> -> vector<64x128xf32>
    %c0_69 = arith.constant 0 : index
    %c0_70 = arith.constant 0 : index
    %67 = vector.load %arg5[%c0_69, %c0_70] : memref<64x128xf32, #tpu.memory_space<vmem>>, vector<64x128xf32>
    %68 = arith.addf %67, %66 : vector<64x128xf32>
    %c0_71 = arith.constant 0 : index
    %c0_72 = arith.constant 0 : index
    %69 = vector.load %arg5[%c0_71, %c0_72] : memref<64x128xf32, #tpu.memory_space<vmem>>, vector<64x128xf32>
    tpu.vector_store %arg5[%c0_71, %c0_72], %68 {strides = array<i32>} : memref<64x128xf32, #tpu.memory_space<vmem>>, vector<64x128xf32>,
    %70 = vector.extract_strided_slice %1 {offsets = [1, 1, 0], sizes = [8, 8, 4], strides = [1, 1, 1]} : vector<9x9x4xbf16> to vector<8x8x4xbf16>
    %71 = vector.shape_cast %70 : vector<8x8x4xbf16> to vector<64x4xbf16>
    %c8 = arith.constant 8 : index
    %c0_73 = arith.constant 0 : index
    %c0_74 = arith.constant 0 : index
    %72 = vector.load %arg2[%c8, %c0_73, %c0_74] : memref<9x4x128xbf16, #tpu.memory_space<vmem>>, vector<1x4x128xbf16>
    %73 = vector.shape_cast %72 : vector<1x4x128xbf16> to vector<4x128xbf16>
    %cst_75 = arith.constant dense<0.000000e+00> : vector<64x128xf32>
    %74 = tpu.matmul %71, %73, %cst_75 {dimension_numbers = #tpu.dot_dimension_numbers<[1], [0], [0], [1], [0, 0, 1, 1], [], []>} : vector<64x4xbf16>, vector<4x128xbf16>, vector<64x128xf32> -> vector<64x128xf32>
    %c0_76 = arith.constant 0 : index
    %c0_77 = arith.constant 0 : index
    %75 = vector.load %arg5[%c0_76, %c0_77] : memref<64x128xf32, #tpu.memory_space<vmem>>, vector<64x128xf32>
    %76 = arith.addf %75, %74 : vector<64x128xf32>
    %c0_78 = arith.constant 0 : index
    %c0_79 = arith.constant 0 : index
    %77 = vector.load %arg5[%c0_78, %c0_79] : memref<64x128xf32, #tpu.memory_space<vmem>>, vector<64x128xf32>
    tpu.vector_store %arg5[%c0_78, %c0_79], %76 {strides = array<i32>} : memref<64x128xf32, #tpu.memory_space<vmem>>, vector<64x128xf32>,
    %c0_80 = arith.constant 0 : index
    %c0_81 = arith.constant 0 : index
    %78 = vector.load %arg5[%c0_80, %c0_81] : memref<64x128xf32, #tpu.memory_space<vmem>>, vector<64x128xf32>
    %c0_82 = arith.constant 0 : index
    %c0_83 = arith.constant 0 : index
    %79 = vector.load %arg3[%c0_82, %c0_83] : memref<1x128xf32, #tpu.memory_space<vmem>>, vector<1x128xf32>
    %80 = vector.broadcast %79 : vector<1x128xf32> to vector<64x128xf32>
    %81 = arith.addf %78, %80 : vector<64x128xf32>
    %cst_84 = arith.constant 0.000000e+00 : f32
    %82 = vector.broadcast %cst_84 : f32 to vector<64x128xf32>
    %83 = arith.maximumf %81, %82 : vector<64x128xf32>
    %84 = vector.shape_cast %83 : vector<64x128xf32> to vector<8x8x128xf32>
    %85 = arith.truncf %84 : vector<8x8x128xf32> to vector<8x8x128xbf16>
    %c0_85 = arith.constant 0 : index
    %c0_86 = arith.constant 0 : index
    %c0_87 = arith.constant 0 : index
    %c0_88 = arith.constant 0 : index
    %86 = vector.load %arg4[%c0_85, %c0_86, %c0_87, %c0_88] : memref<1x8x8x128xbf16, #tpu.memory_space<vmem>>, vector<1x8x8x128xbf16>
    %87 = vector.shape_cast %86 : vector<1x8x8x128xbf16> to vector<8x8x128xbf16>
    %88 = vector.shape_cast %85 : vector<8x8x128xbf16> to vector<1x8x8x128xbf16>
    tpu.vector_store %arg4[%c0_85, %c0_86, %c0_87, %c0_88], %88 {strides = array<i32>} : memref<1x8x8x128xbf16, #tpu.memory_space<vmem>>, vector<1x8x8x128xbf16>,
    return
  }
  func.func @transform_0(%arg0: i32) -> (i32, i32, i32, i32, i32) {
    %c0_i32 = arith.constant 0 : i32
    %c0_i32_0 = arith.constant 0 : i32
    %c0_i32_1 = arith.constant 0 : i32
    %c0_i32_2 = arith.constant 0 : i32
    %c0_i32_3 = arith.constant 0 : i32
    return %arg0, %c0_i32, %c0_i32_0, %c0_i32_1, %c0_i32_2 : i32, i32, i32, i32, i32
  }
  func.func @transform_1(%arg0: i32) -> (i32, i32, i32) {
    %c0_i32 = arith.constant 0 : i32
    %c0_i32_0 = arith.constant 0 : i32
    %c0_i32_1 = arith.constant 0 : i32
    %c0_i32_2 = arith.constant 0 : i32
    return %c0_i32, %c0_i32_0, %c0_i32_1 : i32, i32, i32
  }
  func.func @transform_2(%arg0: i32) -> (i32, i32) {
    %c0_i32 = arith.constant 0 : i32
    %c0_i32_0 = arith.constant 0 : i32
    %c0_i32_1 = arith.constant 0 : i32
    return %c0_i32, %c0_i32_0 : i32, i32
  }
  func.func @transform_3(%arg0: i32) -> (i32, i32, i32, i32) {
    %c0_i32 = arith.constant 0 : i32
    %c0_i32_0 = arith.constant 0 : i32
    %c0_i32_1 = arith.constant 0 : i32
    %c0_i32_2 = arith.constant 0 : i32
    return %arg0, %c0_i32, %c0_i32_0, %c0_i32_1 : i32, i32, i32, i32
  }
}

module attributes {stable_mosaic.version = 11 : i64} {
  func.func @_conv_bn_add_relu_kernel(%arg0: i32, %arg1: memref<1x1x10x10x128xbf16, #tpu.memory_space<vmem>>, %arg2: memref<9x128x128xbf16, #tpu.memory_space<vmem>>, %arg3: memref<1x128xf32, #tpu.memory_space<vmem>>, %arg4: memref<1x8x8x128xbf16, #tpu.memory_space<vmem>>, %arg5: memref<1x8x8x128xf32, #tpu.memory_space<vmem>>, %arg6: memref<64x128xf32, #tpu.memory_space<vmem>>) attributes {dimension_semantics = [#tpu.dimension_semantics<parallel>], iteration_bounds = array<i64: 2>, scalar_prefetch = 0 : i64, scratch_operands = 1 : i64, tpu.core_type = #tpu.core_type<tc>, window_params = [{transform_indices = @transform_0, window_bounds = array<i64: 1, 1, 10, 10, 128>}, {pipeline_mode = #tpu.pipeline_mode<synchronous>, transform_indices = @transform_1, window_bounds = array<i64: 9, 128, 128>}, {pipeline_mode = #tpu.pipeline_mode<synchronous>, transform_indices = @transform_2, window_bounds = array<i64: 1, 128>}, {transform_indices = @transform_3, window_bounds = array<i64: 1, 8, 8, 128>}, {transform_indices = @transform_4, window_bounds = array<i64: 1, 8, 8, 128>}]} {
    %c0 = arith.constant 0 : index
    %c0_0 = arith.constant 0 : index
    %c0_1 = arith.constant 0 : index
    %c0_2 = arith.constant 0 : index
    %c0_3 = arith.constant 0 : index
    %0 = vector.load %arg1[%c0, %c0_0, %c0_1, %c0_2, %c0_3] : memref<1x1x10x10x128xbf16, #tpu.memory_space<vmem>>, vector<1x1x10x10x128xbf16>
    %1 = vector.shape_cast %0 : vector<1x1x10x10x128xbf16> to vector<10x10x128xbf16>
    %2 = vector.extract_strided_slice %1 {offsets = [0, 0, 0], sizes = [8, 8, 128], strides = [1, 1, 1]} : vector<10x10x128xbf16> to vector<8x8x128xbf16>
    %3 = vector.shape_cast %2 : vector<8x8x128xbf16> to vector<64x128xbf16>
    %c0_4 = arith.constant 0 : index
    %c0_5 = arith.constant 0 : index
    %c0_6 = arith.constant 0 : index
    %4 = vector.load %arg2[%c0_4, %c0_5, %c0_6] : memref<9x128x128xbf16, #tpu.memory_space<vmem>>, vector<1x128x128xbf16>
    %5 = vector.shape_cast %4 : vector<1x128x128xbf16> to vector<128x128xbf16>
    %cst = arith.constant dense<0.000000e+00> : vector<64x128xf32>
    %6 = tpu.matmul %3, %5, %cst {dimension_numbers = #tpu.dot_dimension_numbers<[1], [0], [0], [1], [0, 0, 1, 1], [], []>} : vector<64x128xbf16>, vector<128x128xbf16>, vector<64x128xf32> -> vector<64x128xf32>
    %c0_7 = arith.constant 0 : index
    %c0_8 = arith.constant 0 : index
    %7 = vector.load %arg6[%c0_7, %c0_8] : memref<64x128xf32, #tpu.memory_space<vmem>>, vector<64x128xf32>
    tpu.vector_store %arg6[%c0_7, %c0_8], %6 {strides = array<i32>} : memref<64x128xf32, #tpu.memory_space<vmem>>, vector<64x128xf32>,
    %8 = vector.extract_strided_slice %1 {offsets = [0, 1, 0], sizes = [8, 8, 128], strides = [1, 1, 1]} : vector<10x10x128xbf16> to vector<8x8x128xbf16>
    %9 = vector.shape_cast %8 : vector<8x8x128xbf16> to vector<64x128xbf16>
    %c1 = arith.constant 1 : index
    %c0_9 = arith.constant 0 : index
    %c0_10 = arith.constant 0 : index
    %10 = vector.load %arg2[%c1, %c0_9, %c0_10] : memref<9x128x128xbf16, #tpu.memory_space<vmem>>, vector<1x128x128xbf16>
    %11 = vector.shape_cast %10 : vector<1x128x128xbf16> to vector<128x128xbf16>
    %cst_11 = arith.constant dense<0.000000e+00> : vector<64x128xf32>
    %12 = tpu.matmul %9, %11, %cst_11 {dimension_numbers = #tpu.dot_dimension_numbers<[1], [0], [0], [1], [0, 0, 1, 1], [], []>} : vector<64x128xbf16>, vector<128x128xbf16>, vector<64x128xf32> -> vector<64x128xf32>
    %c0_12 = arith.constant 0 : index
    %c0_13 = arith.constant 0 : index
    %13 = vector.load %arg6[%c0_12, %c0_13] : memref<64x128xf32, #tpu.memory_space<vmem>>, vector<64x128xf32>
    %14 = arith.addf %13, %12 : vector<64x128xf32>
    %c0_14 = arith.constant 0 : index
    %c0_15 = arith.constant 0 : index
    %15 = vector.load %arg6[%c0_14, %c0_15] : memref<64x128xf32, #tpu.memory_space<vmem>>, vector<64x128xf32>
    tpu.vector_store %arg6[%c0_14, %c0_15], %14 {strides = array<i32>} : memref<64x128xf32, #tpu.memory_space<vmem>>, vector<64x128xf32>,
    %16 = vector.extract_strided_slice %1 {offsets = [0, 2, 0], sizes = [8, 8, 128], strides = [1, 1, 1]} : vector<10x10x128xbf16> to vector<8x8x128xbf16>
    %17 = vector.shape_cast %16 : vector<8x8x128xbf16> to vector<64x128xbf16>
    %c2 = arith.constant 2 : index
    %c0_16 = arith.constant 0 : index
    %c0_17 = arith.constant 0 : index
    %18 = vector.load %arg2[%c2, %c0_16, %c0_17] : memref<9x128x128xbf16, #tpu.memory_space<vmem>>, vector<1x128x128xbf16>
    %19 = vector.shape_cast %18 : vector<1x128x128xbf16> to vector<128x128xbf16>
    %cst_18 = arith.constant dense<0.000000e+00> : vector<64x128xf32>
    %20 = tpu.matmul %17, %19, %cst_18 {dimension_numbers = #tpu.dot_dimension_numbers<[1], [0], [0], [1], [0, 0, 1, 1], [], []>} : vector<64x128xbf16>, vector<128x128xbf16>, vector<64x128xf32> -> vector<64x128xf32>
    %c0_19 = arith.constant 0 : index
    %c0_20 = arith.constant 0 : index
    %21 = vector.load %arg6[%c0_19, %c0_20] : memref<64x128xf32, #tpu.memory_space<vmem>>, vector<64x128xf32>
    %22 = arith.addf %21, %20 : vector<64x128xf32>
    %c0_21 = arith.constant 0 : index
    %c0_22 = arith.constant 0 : index
    %23 = vector.load %arg6[%c0_21, %c0_22] : memref<64x128xf32, #tpu.memory_space<vmem>>, vector<64x128xf32>
    tpu.vector_store %arg6[%c0_21, %c0_22], %22 {strides = array<i32>} : memref<64x128xf32, #tpu.memory_space<vmem>>, vector<64x128xf32>,
    %24 = vector.extract_strided_slice %1 {offsets = [1, 0, 0], sizes = [8, 8, 128], strides = [1, 1, 1]} : vector<10x10x128xbf16> to vector<8x8x128xbf16>
    %25 = vector.shape_cast %24 : vector<8x8x128xbf16> to vector<64x128xbf16>
    %c3 = arith.constant 3 : index
    %c0_23 = arith.constant 0 : index
    %c0_24 = arith.constant 0 : index
    %26 = vector.load %arg2[%c3, %c0_23, %c0_24] : memref<9x128x128xbf16, #tpu.memory_space<vmem>>, vector<1x128x128xbf16>
    %27 = vector.shape_cast %26 : vector<1x128x128xbf16> to vector<128x128xbf16>
    %cst_25 = arith.constant dense<0.000000e+00> : vector<64x128xf32>
    %28 = tpu.matmul %25, %27, %cst_25 {dimension_numbers = #tpu.dot_dimension_numbers<[1], [0], [0], [1], [0, 0, 1, 1], [], []>} : vector<64x128xbf16>, vector<128x128xbf16>, vector<64x128xf32> -> vector<64x128xf32>
    %c0_26 = arith.constant 0 : index
    %c0_27 = arith.constant 0 : index
    %29 = vector.load %arg6[%c0_26, %c0_27] : memref<64x128xf32, #tpu.memory_space<vmem>>, vector<64x128xf32>
    %30 = arith.addf %29, %28 : vector<64x128xf32>
    %c0_28 = arith.constant 0 : index
    %c0_29 = arith.constant 0 : index
    %31 = vector.load %arg6[%c0_28, %c0_29] : memref<64x128xf32, #tpu.memory_space<vmem>>, vector<64x128xf32>
    tpu.vector_store %arg6[%c0_28, %c0_29], %30 {strides = array<i32>} : memref<64x128xf32, #tpu.memory_space<vmem>>, vector<64x128xf32>,
    %32 = vector.extract_strided_slice %1 {offsets = [1, 1, 0], sizes = [8, 8, 128], strides = [1, 1, 1]} : vector<10x10x128xbf16> to vector<8x8x128xbf16>
    %33 = vector.shape_cast %32 : vector<8x8x128xbf16> to vector<64x128xbf16>
    %c4 = arith.constant 4 : index
    %c0_30 = arith.constant 0 : index
    %c0_31 = arith.constant 0 : index
    %34 = vector.load %arg2[%c4, %c0_30, %c0_31] : memref<9x128x128xbf16, #tpu.memory_space<vmem>>, vector<1x128x128xbf16>
    %35 = vector.shape_cast %34 : vector<1x128x128xbf16> to vector<128x128xbf16>
    %cst_32 = arith.constant dense<0.000000e+00> : vector<64x128xf32>
    %36 = tpu.matmul %33, %35, %cst_32 {dimension_numbers = #tpu.dot_dimension_numbers<[1], [0], [0], [1], [0, 0, 1, 1], [], []>} : vector<64x128xbf16>, vector<128x128xbf16>, vector<64x128xf32> -> vector<64x128xf32>
    %c0_33 = arith.constant 0 : index
    %c0_34 = arith.constant 0 : index
    %37 = vector.load %arg6[%c0_33, %c0_34] : memref<64x128xf32, #tpu.memory_space<vmem>>, vector<64x128xf32>
    %38 = arith.addf %37, %36 : vector<64x128xf32>
    %c0_35 = arith.constant 0 : index
    %c0_36 = arith.constant 0 : index
    %39 = vector.load %arg6[%c0_35, %c0_36] : memref<64x128xf32, #tpu.memory_space<vmem>>, vector<64x128xf32>
    tpu.vector_store %arg6[%c0_35, %c0_36], %38 {strides = array<i32>} : memref<64x128xf32, #tpu.memory_space<vmem>>, vector<64x128xf32>,
    %40 = vector.extract_strided_slice %1 {offsets = [1, 2, 0], sizes = [8, 8, 128], strides = [1, 1, 1]} : vector<10x10x128xbf16> to vector<8x8x128xbf16>
    %41 = vector.shape_cast %40 : vector<8x8x128xbf16> to vector<64x128xbf16>
    %c5 = arith.constant 5 : index
    %c0_37 = arith.constant 0 : index
    %c0_38 = arith.constant 0 : index
    %42 = vector.load %arg2[%c5, %c0_37, %c0_38] : memref<9x128x128xbf16, #tpu.memory_space<vmem>>, vector<1x128x128xbf16>
    %43 = vector.shape_cast %42 : vector<1x128x128xbf16> to vector<128x128xbf16>
    %cst_39 = arith.constant dense<0.000000e+00> : vector<64x128xf32>
    %44 = tpu.matmul %41, %43, %cst_39 {dimension_numbers = #tpu.dot_dimension_numbers<[1], [0], [0], [1], [0, 0, 1, 1], [], []>} : vector<64x128xbf16>, vector<128x128xbf16>, vector<64x128xf32> -> vector<64x128xf32>
    %c0_40 = arith.constant 0 : index
    %c0_41 = arith.constant 0 : index
    %45 = vector.load %arg6[%c0_40, %c0_41] : memref<64x128xf32, #tpu.memory_space<vmem>>, vector<64x128xf32>
    %46 = arith.addf %45, %44 : vector<64x128xf32>
    %c0_42 = arith.constant 0 : index
    %c0_43 = arith.constant 0 : index
    %47 = vector.load %arg6[%c0_42, %c0_43] : memref<64x128xf32, #tpu.memory_space<vmem>>, vector<64x128xf32>
    tpu.vector_store %arg6[%c0_42, %c0_43], %46 {strides = array<i32>} : memref<64x128xf32, #tpu.memory_space<vmem>>, vector<64x128xf32>,
    %48 = vector.extract_strided_slice %1 {offsets = [2, 0, 0], sizes = [8, 8, 128], strides = [1, 1, 1]} : vector<10x10x128xbf16> to vector<8x8x128xbf16>
    %49 = vector.shape_cast %48 : vector<8x8x128xbf16> to vector<64x128xbf16>
    %c6 = arith.constant 6 : index
    %c0_44 = arith.constant 0 : index
    %c0_45 = arith.constant 0 : index
    %50 = vector.load %arg2[%c6, %c0_44, %c0_45] : memref<9x128x128xbf16, #tpu.memory_space<vmem>>, vector<1x128x128xbf16>
    %51 = vector.shape_cast %50 : vector<1x128x128xbf16> to vector<128x128xbf16>
    %cst_46 = arith.constant dense<0.000000e+00> : vector<64x128xf32>
    %52 = tpu.matmul %49, %51, %cst_46 {dimension_numbers = #tpu.dot_dimension_numbers<[1], [0], [0], [1], [0, 0, 1, 1], [], []>} : vector<64x128xbf16>, vector<128x128xbf16>, vector<64x128xf32> -> vector<64x128xf32>
    %c0_47 = arith.constant 0 : index
    %c0_48 = arith.constant 0 : index
    %53 = vector.load %arg6[%c0_47, %c0_48] : memref<64x128xf32, #tpu.memory_space<vmem>>, vector<64x128xf32>
    %54 = arith.addf %53, %52 : vector<64x128xf32>
    %c0_49 = arith.constant 0 : index
    %c0_50 = arith.constant 0 : index
    %55 = vector.load %arg6[%c0_49, %c0_50] : memref<64x128xf32, #tpu.memory_space<vmem>>, vector<64x128xf32>
    tpu.vector_store %arg6[%c0_49, %c0_50], %54 {strides = array<i32>} : memref<64x128xf32, #tpu.memory_space<vmem>>, vector<64x128xf32>,
    %56 = vector.extract_strided_slice %1 {offsets = [2, 1, 0], sizes = [8, 8, 128], strides = [1, 1, 1]} : vector<10x10x128xbf16> to vector<8x8x128xbf16>
    %57 = vector.shape_cast %56 : vector<8x8x128xbf16> to vector<64x128xbf16>
    %c7 = arith.constant 7 : index
    %c0_51 = arith.constant 0 : index
    %c0_52 = arith.constant 0 : index
    %58 = vector.load %arg2[%c7, %c0_51, %c0_52] : memref<9x128x128xbf16, #tpu.memory_space<vmem>>, vector<1x128x128xbf16>
    %59 = vector.shape_cast %58 : vector<1x128x128xbf16> to vector<128x128xbf16>
    %cst_53 = arith.constant dense<0.000000e+00> : vector<64x128xf32>
    %60 = tpu.matmul %57, %59, %cst_53 {dimension_numbers = #tpu.dot_dimension_numbers<[1], [0], [0], [1], [0, 0, 1, 1], [], []>} : vector<64x128xbf16>, vector<128x128xbf16>, vector<64x128xf32> -> vector<64x128xf32>
    %c0_54 = arith.constant 0 : index
    %c0_55 = arith.constant 0 : index
    %61 = vector.load %arg6[%c0_54, %c0_55] : memref<64x128xf32, #tpu.memory_space<vmem>>, vector<64x128xf32>
    %62 = arith.addf %61, %60 : vector<64x128xf32>
    %c0_56 = arith.constant 0 : index
    %c0_57 = arith.constant 0 : index
    %63 = vector.load %arg6[%c0_56, %c0_57] : memref<64x128xf32, #tpu.memory_space<vmem>>, vector<64x128xf32>
    tpu.vector_store %arg6[%c0_56, %c0_57], %62 {strides = array<i32>} : memref<64x128xf32, #tpu.memory_space<vmem>>, vector<64x128xf32>,
    %64 = vector.extract_strided_slice %1 {offsets = [2, 2, 0], sizes = [8, 8, 128], strides = [1, 1, 1]} : vector<10x10x128xbf16> to vector<8x8x128xbf16>
    %65 = vector.shape_cast %64 : vector<8x8x128xbf16> to vector<64x128xbf16>
    %c8 = arith.constant 8 : index
    %c0_58 = arith.constant 0 : index
    %c0_59 = arith.constant 0 : index
    %66 = vector.load %arg2[%c8, %c0_58, %c0_59] : memref<9x128x128xbf16, #tpu.memory_space<vmem>>, vector<1x128x128xbf16>
    %67 = vector.shape_cast %66 : vector<1x128x128xbf16> to vector<128x128xbf16>
    %cst_60 = arith.constant dense<0.000000e+00> : vector<64x128xf32>
    %68 = tpu.matmul %65, %67, %cst_60 {dimension_numbers = #tpu.dot_dimension_numbers<[1], [0], [0], [1], [0, 0, 1, 1], [], []>} : vector<64x128xbf16>, vector<128x128xbf16>, vector<64x128xf32> -> vector<64x128xf32>
    %c0_61 = arith.constant 0 : index
    %c0_62 = arith.constant 0 : index
    %69 = vector.load %arg6[%c0_61, %c0_62] : memref<64x128xf32, #tpu.memory_space<vmem>>, vector<64x128xf32>
    %70 = arith.addf %69, %68 : vector<64x128xf32>
    %c0_63 = arith.constant 0 : index
    %c0_64 = arith.constant 0 : index
    %71 = vector.load %arg6[%c0_63, %c0_64] : memref<64x128xf32, #tpu.memory_space<vmem>>, vector<64x128xf32>
    tpu.vector_store %arg6[%c0_63, %c0_64], %70 {strides = array<i32>} : memref<64x128xf32, #tpu.memory_space<vmem>>, vector<64x128xf32>,
    %c0_65 = arith.constant 0 : index
    %c0_66 = arith.constant 0 : index
    %c0_67 = arith.constant 0 : index
    %c0_68 = arith.constant 0 : index
    %72 = vector.load %arg4[%c0_65, %c0_66, %c0_67, %c0_68] : memref<1x8x8x128xbf16, #tpu.memory_space<vmem>>, vector<1x8x8x128xbf16>
    %73 = vector.shape_cast %72 : vector<1x8x8x128xbf16> to vector<8x8x128xbf16>
    %74 = vector.shape_cast %73 : vector<8x8x128xbf16> to vector<64x128xbf16>
    %75 = arith.extf %74 : vector<64x128xbf16> to vector<64x128xf32>
    %c0_69 = arith.constant 0 : index
    %c0_70 = arith.constant 0 : index
    %76 = vector.load %arg6[%c0_69, %c0_70] : memref<64x128xf32, #tpu.memory_space<vmem>>, vector<64x128xf32>
    %c0_71 = arith.constant 0 : index
    %c0_72 = arith.constant 0 : index
    %77 = vector.load %arg3[%c0_71, %c0_72] : memref<1x128xf32, #tpu.memory_space<vmem>>, vector<1x128xf32>
    %78 = vector.broadcast %77 : vector<1x128xf32> to vector<64x128xf32>
    %79 = arith.addf %76, %78 : vector<64x128xf32>
    %80 = arith.addf %79, %75 : vector<64x128xf32>
    %cst_73 = arith.constant 0.000000e+00 : f32
    %81 = vector.broadcast %cst_73 : f32 to vector<64x128xf32>
    %82 = arith.maximumf %80, %81 : vector<64x128xf32>
    %83 = vector.shape_cast %82 : vector<64x128xf32> to vector<8x8x128xf32>
    %c0_74 = arith.constant 0 : index
    %c0_75 = arith.constant 0 : index
    %c0_76 = arith.constant 0 : index
    %c0_77 = arith.constant 0 : index
    %84 = vector.load %arg5[%c0_74, %c0_75, %c0_76, %c0_77] : memref<1x8x8x128xf32, #tpu.memory_space<vmem>>, vector<1x8x8x128xf32>
    %85 = vector.shape_cast %84 : vector<1x8x8x128xf32> to vector<8x8x128xf32>
    %86 = vector.shape_cast %83 : vector<8x8x128xf32> to vector<1x8x8x128xf32>
    tpu.vector_store %arg5[%c0_74, %c0_75, %c0_76, %c0_77], %86 {strides = array<i32>} : memref<1x8x8x128xf32, #tpu.memory_space<vmem>>, vector<1x8x8x128xf32>,
    return
  }
  func.func @transform_0(%arg0: i32) -> (i32, i32, i32, i32, i32) {
    %c0_i32 = arith.constant 0 : i32
    %c0_i32_0 = arith.constant 0 : i32
    %c0_i32_1 = arith.constant 0 : i32
    %c0_i32_2 = arith.constant 0 : i32
    %c0_i32_3 = arith.constant 0 : i32
    return %arg0, %c0_i32, %c0_i32_0, %c0_i32_1, %c0_i32_2 : i32, i32, i32, i32, i32
  }
  func.func @transform_1(%arg0: i32) -> (i32, i32, i32) {
    %c0_i32 = arith.constant 0 : i32
    %c0_i32_0 = arith.constant 0 : i32
    %c0_i32_1 = arith.constant 0 : i32
    %c0_i32_2 = arith.constant 0 : i32
    return %c0_i32, %c0_i32_0, %c0_i32_1 : i32, i32, i32
  }
  func.func @transform_2(%arg0: i32) -> (i32, i32) {
    %c0_i32 = arith.constant 0 : i32
    %c0_i32_0 = arith.constant 0 : i32
    %c0_i32_1 = arith.constant 0 : i32
    return %c0_i32, %c0_i32_0 : i32, i32
  }
  func.func @transform_3(%arg0: i32) -> (i32, i32, i32, i32) {
    %c0_i32 = arith.constant 0 : i32
    %c0_i32_0 = arith.constant 0 : i32
    %c0_i32_1 = arith.constant 0 : i32
    %c0_i32_2 = arith.constant 0 : i32
    return %arg0, %c0_i32, %c0_i32_0, %c0_i32_1 : i32, i32, i32, i32
  }
  func.func @transform_4(%arg0: i32) -> (i32, i32, i32, i32) {
    %c0_i32 = arith.constant 0 : i32
    %c0_i32_0 = arith.constant 0 : i32
    %c0_i32_1 = arith.constant 0 : i32
    %c0_i32_2 = arith.constant 0 : i32
    return %arg0, %c0_i32, %c0_i32_0, %c0_i32_1 : i32, i32, i32, i32
  }
}

</mosaic_0001>

<bundles_post_ra>
// kernel: basic_block_forward.2
= control target key start
LH: loop header
LB: loop body
LE: loop exit
PB: predicated region body
PF: predicated region fallthrough
CT: control target
= control target key end

     0   :  { %s2049_s12 = smov 0   ;;  %s2418_s0 = inlined_call_operand.vmem [shape: bf16[2,4,9,9,4], index: 0, kind: input, shape index: {}]   ;;  %s2419_s1 = inlined_call_operand.vmem [shape: bf16[9,4,128], index: 1, kind: input, shape index: {}]   ;;  %s2420_s2 = inlined_call_operand.vmem [shape: f32[1,128], index: 2, kind: input, shape index: {}]   ;;  %s2421_s3 = inlined_call_operand.vmem [shape: bf16[2,8,8,128], index: 3, kind: output, shape index: {}]  }
   0x1 LB: > { %s1629_s13 = sadd.s32 4294967295, %s2027_s12   ;;  %p1633_p0 = scmp.ge.s32.totalorder %s2027_s12, 1  ;;  %s2027_s12 = sphi %s2049_s12, %s13_s12  }
   0x2   : > { %p137_p1 = scmp.lt.s32.totalorder %s2027_s12, 3 }
   0x4   : > { %p138_p2 = pnand %p1633_p0, %p137_p1 }
   0x5   : > { %v226_v0 = vld [vmem:[%s2419_s1] sm:$0x3] (!%p138_p2)  ;;  %vm260_vm0 = vcmask (!%p138_p2), 1041408   ;;  %v2063_v1 = vld [vmem:[%s2419_s1 + $0x8] sm:$0x3] (!%p138_p2)  ;;  %p161_p3 = scmp.lt.s32.totalorder (!%p138_p2), %s1629_s13, 1 }
   0x6   : > { %141 = sbr.rel (%p138_p2) target bundleno = 325 (0x145), region = 32  ;;  %1978 = vmatprep.subr.msk.bf16.mxu1 (!%p138_p2), %vm260_vm0, %v226_v0  ;;  %1982 = vmatprep.subr.msk.bf16.mxu0 (!%p138_p2), %vm260_vm0, %v2063_v1  ;;  %v262_v2 = vsel (!%p138_p2), %vm260_vm0, %v226_v0, 0  ;;  %v2071_v3 = vsel (!%p138_p2), %vm260_vm0, %v2063_v1, 0  ;;  %v1678_v4 = vld [vmem:[%s2419_s1 + $0x2] sm:$0x3] (!%p138_p2)  ;;  %vm247_vm1 = vcmask (!%p138_p2), 31744  }
   0x7   : > { %1823 = vmatpush3.bf16.msra.mxu1 (!%p138_p2), %v262_v2  ;;  %1863 = vmatpush3.bf16.msra.mxu0 (!%p138_p2), %v2071_v3  ;;  %v1714_v5 = vld [vmem:[%s2419_s1 + $0xa] sm:$0x3] (!%p138_p2)  ;;  %v372_v6 = vsel (!%p138_p2), %vm260_vm0, %v1678_v4, 0  ;;  %v1723_v17 = vld [vmem:[%s2419_s1 + $0xc] sm:$0x3] (!%p138_p2) }
   0x8   : > { %1979 = vmatprep.subr.msk.bf16.mxu1 (!%p138_p2), %vm260_vm0, %v1678_v4  ;;  %1984 = vmatprep.subr.msk.bf16.mxu0 (!%p138_p2), %vm260_vm0, %v1714_v5  ;;  %v1087_v16 = vsel (!%p138_p2), %vm260_vm0, %v1714_v5, 0  ;;  %v1687_v18 = vld [vmem:[%s2419_s1 + $0x4] sm:$0x3] (!%p138_p2)  ;;  %v2117_v24 = vld [vmem:[%s2419_s1 + $0x6] sm:$0x3] (!%p138_p2)  ;;  %v2140_v39 = vsel (!%p138_p2), %vm260_vm0, %v1723_v17, 0 }
   0x9   : > { %vm463_vm2 = vsmask.f32 (!%p138_p2), 3328  ;;  %vm464_vm3 = vsmask.f32 (!%p138_p2), 7440  ;;  %v2143_v40 = vsel (!%p138_p2), %vm260_vm0, %v1687_v18, 0  ;;  %v2155_v45 = vsel (!%p138_p2), %vm260_vm0, %v2117_v24, 0 }
   0xa   : > { %vm2199_vm4 = vmor (!%p138_p2), %vm463_vm2, %vm464_vm3 }
   0xd   : > { %s2425_s13 = smov (!%p161_p3, %s1629_s13), 1 }
   0xe   : > { %s1988_s22 = smul.u32 288, %s2425_s13  ;;  %s1753_s11 = sshll.u32 %s2425_s13, 5 }
   0xf   : > { %s170_s16 = scalar_lea.vmem %s2421_s3, %s1753_s11 }
  0x10   : > { %s2088_s25 = scalar_lea.vmem %s2418_s0, %s1988_s22 }
  0x11   : > { %v172_v7 = vld [vmem:[%s2088_s25] sm:$0xf]  ;;  %v2093_v8 = vld [vmem:[%s2088_s25 + $0x8] sm:$0xf]  ;;  %v2100_v15 = vld [vmem:[%s2088_s25 + $0x10] sm:$0xf] }
  0x12   : > { %v1670_v9 = vcombine.low %v172_v7, %v2093_v8  ;;  %v467_v10 = vshrl.u32 %v172_v7, 16  ;;  %v470_v11 = vshll.u32 %v172_v7, 16  ;;  %v481_v12 = vshrl.u32 %v2093_v8, 16  ;;  %v1998_v14 = vld [vmem:[%s2088_s25 + $0xd8] ss:$8 sps:$4 sm:$0xff]  }
  0x13   : > { %v484_v13 = vshll.u32 %v2093_v8, 16  ;;  %v2111_v22 = vld [vmem:[%s2088_s25 + $0x18] sm:$0xf]  ;;  %v495_v23 = vshrl.u32 %v2100_v15, 16  ;;  %1864 = vmatprep.mubr.msk.bf16.mxu0 %vm247_vm1, %v1998_v14  ;;  %v498_v27 = vshll.u32 %v2100_v15, 16 }
  0x14   : > { %1824 = vmatprep.mubr.msk.bf16.mxu1 %vm247_vm1, %v1670_v9  ;;  %v469_v19 = vrot.slane %v467_v10, 4  ;;  %v472_v20 = vrot.slane %v470_v11, 5  ;;  %v483_v21 = vrot.slane %v481_v12, 4  ;;  %v1671_v26 = vcombine.low %v2100_v15, %v2111_v22  ;;  %v2000_v32 = vld [vmem:[%s2088_s25 + $0xe8] ss:$8 sps:$4 sm:$0xff]  }
  0x15   : > { %v486_v25 = vrot.slane %v484_v13, 5  ;;  %v509_v28 = vshrl.u32 %v2111_v22, 16  ;;  %v497_v30 = vrot.slane %v495_v23, 4  ;;  %v512_v31 = vshll.u32 %v2111_v22, 16  ;;  %v2128_v35 = vld [vmem:[%s2088_s25 + $0x20] sm:$0xf]  ;;  %1865 = vmatmul.mubr.msk.bf16.vlgmr.msra.gmra.mrb[0].mxu0 %vm247_vm1, %v2000_v32 }
  0x16   : > { %v473_v29 = vor.u32 %v472_v20, %v469_v19  ;;  %1825 = vmatmul.mubr.msk.bf16.vlgmr.msra.gmra.mrb[0].mxu1 %vm247_vm1, %v1671_v26  ;;  %v500_v34 = vrot.slane %v498_v27, 5  ;;  %v2131_v36 = vld [vmem:[%s2088_s25 + $0x28] sm:$0xf]  ;;  %v2137_v38 = vld [vmem:[%s2088_s25 + $0x30] sm:$0xf]  ;;  %1873 = vmatpush3.bf16.msra.mxu0 %v1087_v16  ;;  %v523_v47 = vshrl.u32 %v2128_v35, 16 }
  0x17   : > { %v487_v33 = vor.u32 %v486_v25, %v483_v21  ;;  %1833 = vmatpush3.bf16.msra.mxu1 %v372_v6  ;;  %v1672_v37 = vcombine.low %v2128_v35, %v2131_v36  ;;  %v2147_v43 = vrot.slane %v509_v28, 4  ;;  %v2150_v44 = vld [vmem:[%s2088_s25 + $0x38] sm:$0xf]  ;;  %v2157_v46 = vrot.slane %v512_v31, 5  ;;  %v2162_v48 = vld [vmem:[%s2088_s25 + $0x90] sm:$0xf]  ;;  %1985 = vmatprep.subr.msk.bf16.mxu0 %vm260_vm0, %v1723_v17 }
  0x18   : > { %v2145_v41 = vrot.slane %v473_v29, 4  ;;  %v501_v42 = vor.u32 %v500_v34, %v497_v30  ;;  %1980 = vmatprep.subr.msk.bf16.mxu1 %vm260_vm0, %v1687_v18  ;;  %v1647_v49 = vld [vmem:[%s2088_s25 + $0x94] sm:$0x1]  ;;  %v526_v51 = vshll.u32 %v2128_v35, 16  ;;  %v537_v52 = vshrl.u32 %v2131_v36, 16 }
  0x19   : > { %1828 = vmatprep.mubr.msk.bf16.mxu1 %vm247_vm1, %v1672_v37  ;;  %v2166_v50 = vrot.slane %v487_v33, 4  ;;  %v1673_v53 = vcombine.low %v2137_v38, %v2150_v44  ;;  %v2173_v54 = vld [vmem:[%s2088_s25 + $0x98] sm:$0xf]  ;;  %v540_v56 = vshll.u32 %v2131_v36, 16  ;;  %v1649_v57 = vld [vmem:[%s2088_s25 + $0x9c] sm:$0x1]  ;;  %v515_v2 = vor.u32 %v2157_v46, %v2147_v43 }
  0x1a   : > { %v2175_v55 = vrot.slane %v501_v42, 4  ;;  %v949_v58 = vshrl.u32 %v2162_v48, 16  ;;  %v952_v59 = vshll.u32 %v2162_v48, 16  ;;  %v958_v60 = vshll.u32 %v1647_v49, 16  ;;  %v2184_v0 = vld [vmem:[%s2088_s25 + $0xa0] sm:$0xf] }
  0x1b   : > { %v963_v61 = vshrl.u32 %v2173_v54, 16  ;;  %v966_v62 = vshll.u32 %v2173_v54, 16  ;;  %v972_v63 = vshll.u32 %v1649_v57, 16  ;;  %v1651_v6 = vld [vmem:[%s2088_s25 + $0xa4] sm:$0x1]  ;;  %v977_v16 = vshrl.u32 %v2184_v0, 16 }
  0x1c   : > { %v951_v4 = vrot.slane %v949_v58, 4  ;;  %v954_v5 = vrot.slane %v952_v59, 5  ;;  %v2190_v7 = vld [vmem:[%s2088_s25 + $0xa8] sm:$0xf]  ;;  %v960_v9 = vrot.slane %v958_v60, 5  ;;  %v980_v17 = vshll.u32 %v2184_v0, 16 }
  0x1d   : > { %v965_v10 = vrot.slane %v963_v61, 4  ;;  %v968_v11 = vrot.slane %v966_v62, 5  ;;  %v974_v12 = vrot.slane %v972_v63, 5  ;;  %v1653_v13 = vld [vmem:[%s2088_s25 + $0xac] sm:$0x1]  ;;  %v986_v18 = vshll.u32 %v1651_v6, 16 }
  0x1e   : > { %1829 = vmatmul.mubr.msk.bf16.gmra.mrb[4].mxu1 %vm247_vm1, %v1673_v53  ;;  %v955_v14 = vor.u32 %v954_v5, %v951_v4  ;;  %v1637_v19 = vld [vmem:[%s2088_s25 + $0x48] sm:$0xf]  ;;  %v991_v23 = vshrl.u32 %v2190_v7, 16  ;;  %v994_v25 = vshll.u32 %v2190_v7, 16  ;;  %v1000_v26 = vshll.u32 %v1653_v13, 16 }
  0x1f   : > { %v969_v21 = vor.u32 %v968_v11, %v965_v10  ;;  %v2206_v27 = vld [vmem:[%s2088_s25 + $0x50] sm:$0xf]  ;;  %v979_v29 = vrot.slane %v977_v16, 4  ;;  %v982_v30 = vrot.slane %v980_v17, 5  ;;  %v988_v31 = vrot.slane %v986_v18, 5 }
  0x20   : > { %v956_v28 = vrot.slane %v955_v14, 4  ;;  %v2209_v32 = vld [vmem:[%s2088_s25 + $0x58] sm:$0xf]  ;;  %v993_v34 = vrot.slane %v991_v23, 4  ;;  %v996_v37 = vrot.slane %v994_v25, 5  ;;  %v1002_v42 = vrot.slane %v1000_v26, 5 }
  0x21   : > { %v970_v33 = vrot.slane %v969_v21, 4  ;;  %v2212_v49 = vld [vmem:[%s2088_s25 + $0x60] sm:$0xf]  ;;  %v983_v57 = vor.u32 %v982_v30, %v979_v29  ;;  %v1679_v58 = vcombine.low %v1637_v19, %v2206_v27  ;;  %v2220_v60 = vld [vmem:[%s2088_s25 + $0xb0] sm:$0xf] }
  0x22   : > { %v961_v53 = vsel %vm2199_vm4, %v956_v28, %v960_v9  ;;  %v1680_v59 = vcombine.low %v2209_v32, %v2212_v49  ;;  %v1655_v61 = vld [vmem:[%s2088_s25 + $0xb4] sm:$0x1]  ;;  %v2224_v62 = vld [vmem:[%s2088_s25 + $0xb8] sm:$0xf]  ;;  %v997_v4 = vor.u32 %v996_v37, %v993_v34  ;;  %v1657_v5 = vld [vmem:[%s2088_s25 + $0xbc] sm:$0x1] }
  0x23   : > { %v975_v63 = vsel %vm2199_vm4, %v970_v33, %v974_v12  ;;  %v1005_v6 = vshrl.u32 %v2220_v60, 16  ;;  %v1008_v9 = vshll.u32 %v2220_v60, 16  ;;  %v2232_v10 = vld [vmem:[%s2088_s25 + $0xc0] sm:$0xf]  ;;  %v984_v13 = vrot.slane %v983_v57, 4  ;;  %1834 = vmatprep.mubr.msk.bf16.mxu1 %vm247_vm1, %v1679_v58 }
  0x24   : > { %v1715_v11 = vcombine.low %v961_v53, %v975_v63  ;;  %v1014_v14 = vshll.u32 %v1655_v61, 16  ;;  %v1019_v16 = vshrl.u32 %v2224_v62, 16  ;;  %v1659_v17 = vld [vmem:[%s2088_s25 + $0xc4] sm:$0x1]  ;;  %v998_v18 = vrot.slane %v997_v4, 4 }
  0x25   : > { %v1007_v12 = vrot.slane %v1005_v6, 4  ;;  %v1010_v19 = vrot.slane %v1008_v9, 5  ;;  %v1022_v21 = vshll.u32 %v2224_v62, 16  ;;  %v2240_v23 = vld [vmem:[%s2088_s25 + $0xc8] sm:$0xf]  ;;  %v989_v25 = vsel %vm2199_vm4, %v984_v13, %v988_v31 }
  0x26   : > { %1835 = vmatmul.mubr.msk.bf16.vlgmr.msra.gmra.mrb[0].mxu1 %vm247_vm1, %v1680_v59  ;;  %1874 = vmatprep.mubr.msk.bf16.mxu0 %vm247_vm1, %v1715_v11  ;;  %v1016_v26 = vrot.slane %v1014_v14, 5  ;;  %v1021_v28 = vrot.slane %v1019_v16, 4  ;;  %v1028_v29 = vshll.u32 %v1657_v5, 16  ;;  %v1661_v30 = vld [vmem:[%s2088_s25 + $0xcc] sm:$0x1]  ;;  %v1003_v33 = vsel %vm2199_vm4, %v998_v18, %v1002_v42 }
  0x27   : > { %1843 = vmatpush3.bf16.msra.mxu1 %v2143_v40  ;;  %v1011_v34 = vor.u32 %v1010_v19, %v1007_v12  ;;  %v1024_v37 = vrot.slane %v1022_v21, 5  ;;  %v1033_v53 = vshrl.u32 %v2232_v10, 16  ;;  %v2251_v57 = vld [vmem:[%s2088_s25 + $0x68] sm:$0xf]  ;;  %v2254_v58 = vld [vmem:[%s2088_s25 + $0x70] sm:$0xf]  ;;  %v1716_v31 = vcombine.low %v989_v25, %v1003_v33 }
  0x28   : > { %v2259_v40 = vld [vmem:[%s2419_s1 + $0xe] sm:$0x3]  ;;  %1981 = vmatprep.subr.msk.bf16.mxu1 %vm260_vm0, %v2117_v24  ;;  %v1030_v42 = vrot.slane %v1028_v29, 5  ;;  %v1036_v59 = vshll.u32 %v2232_v10, 16  ;;  %v1042_v61 = vshll.u32 %v1659_v17, 16  ;;  %v1047_v9 = vshrl.u32 %v2240_v23, 16 }
  0x29   : > { %v2265_v63 = vld [vmem:[%s2088_s25 + $0x78] sm:$0xf]  ;;  %v1012_v4 = vrot.slane %v1011_v34, 4  ;;  %v1025_v5 = vor.u32 %v1024_v37, %v1021_v28  ;;  %v1035_v6 = vrot.slane %v1033_v53, 4  ;;  %v2269_v11 = vld [vmem:[%s2088_s25 + $0x80] sm:$0xf]  ;;  %1875 = vmatmul.mubr.msk.bf16.vlgmr.msra.gmra.mrb[0].mxu0 %vm247_vm1, %v1716_v31  ;;  %v1681_v21 = vcombine.low %v2251_v57, %v2254_v58 }
  0x2a   : > { %v551_v13 = vshrl.u32 %v2137_v38, 16  ;;  %v1038_v24 = vrot.slane %v1036_v59, 5  ;;  %v1050_v14 = vshll.u32 %v2240_v23, 16  ;;  %v1056_v16 = vshll.u32 %v1661_v30, 16  ;;  %v173_v17 = vld [vmem:[%s2088_s25 + $0x4] sm:$0x1]  ;;  %1883 = vmatpush3.bf16.msra.mxu0 %v2140_v39 }
  0x2b   : > { %v1017_v18 = vsel %vm2199_vm4, %v1012_v4, %v1016_v26  ;;  %v1026_v12 = vrot.slane %v1025_v5, 4  ;;  %v1049_v19 = vrot.slane %v1047_v9, 4  ;;  %v175_v25 = vld [vmem:[%s2088_s25 + $0xc] sm:$0x1]  ;;  %v177_v28 = vld [vmem:[%s2088_s25 + $0x14] sm:$0x1]  ;;  %1986 = vmatprep.subr.msk.bf16.mxu0 %vm260_vm0, %v2259_v40  ;;  %1838 = vmatprep.mubr.msk.bf16.mxu1 %vm247_vm1, %v1681_v21  ;;  %v1682_v26 = vcombine.low %v2265_v63, %v2269_v11 }
  0x2c   : > { %v1039_v29 = vor.u32 %v1038_v24, %v1035_v6  ;;  %v1044_v33 = vrot.slane %v1042_v61, 5  ;;  %v1052_v34 = vrot.slane %v1050_v14, 5  ;;  %v1058_v37 = vrot.slane %v1056_v16, 5  ;;  %v179_v30 = vld [vmem:[%s2088_s25 + $0x1c] sm:$0x1] }
  0x2d   : > { %v1031_v39 = vsel %vm2199_vm4, %v1026_v12, %v1030_v42  ;;  %v476_v53 = vshll.u32 %v173_v17, 16  ;;  %v490_v31 = vshll.u32 %v175_v25, 16  ;;  %v504_v61 = vshll.u32 %v177_v28, 16 }
  0x2e   : > { %v1717_v59 = vcombine.low %v1017_v18, %v1031_v39  ;;  %v1040_v4 = vrot.slane %v1039_v29, 4  ;;  %v1053_v5 = vor.u32 %v1052_v34, %v1049_v19  ;;  %v516_v6 = vrot.slane %v515_v2, 4  ;;  %1839 = vmatmul.mubr.msk.bf16.gmra.mrb[4].mxu1 %vm247_vm1, %v1682_v26  ;;  %v181_v19 = vld [vmem:[%s2088_s25 + $0x24] sm:$0x1]  ;;  %v183_v29 = vld [vmem:[%s2088_s25 + $0x2c] sm:$0x1] }
  0x2f   : > { %v478_v9 = vrot.slane %v476_v53, 5  ;;  %v492_v42 = vrot.slane %v490_v31, 5  ;;  %v518_v24 = vshll.u32 %v179_v30, 16  ;;  %v554_v14 = vshll.u32 %v2137_v38, 16 }
  0x30   : > { %1878 = vmatprep.mubr.msk.bf16.mxu0 %vm247_vm1, %v1717_v59  ;;  %v1045_v16 = vsel %vm2199_vm4, %v1040_v4, %v1044_v33  ;;  %v1054_v17 = vrot.slane %v1053_v5, 4  ;;  %v506_v18 = vrot.slane %v504_v61, 5  ;;  %v565_v12 = vshrl.u32 %v2150_v44, 16 }
  0x31   : > { %v479_v43 = vsel %vm2199_vm4, %v2145_v41, %v478_v9  ;;  %v2305_v46 = vsel %vm2199_vm4, %v2166_v50, %v492_v42  ;;  %v520_v2 = vrot.slane %v518_v24, 5  ;;  %v1724_v25 = vcombine.low %v2093_v8, %v2100_v15  ;;  %v185_v8 = vld [vmem:[%s2088_s25 + $0x34] sm:$0x1] }
  0x32   : > { %v1059_v21 = vsel %vm2199_vm4, %v1054_v17, %v1058_v37  ;;  %v1688_v28 = vcombine.low %v479_v43, %v2305_v46  ;;  %v2316_v41 = vsel %vm2199_vm4, %v2175_v55, %v506_v18  ;;  %v568_v50 = vshll.u32 %v2150_v44, 16 }
  0x33   : > { %v1718_v33 = vcombine.low %v1045_v16, %v1059_v21  ;;  %v2322_v34 = vsel %vm2199_vm4, %v516_v6, %v520_v2  ;;  %v525_v37 = vrot.slane %v523_v47, 4  ;;  %v528_v55 = vrot.slane %v526_v51, 5  ;;  %v187_v47 = vld [vmem:[%s2088_s25 + $0x3c] sm:$0x1] }
  0x34   : > { %1844 = vmatprep.mubr.msk.bf16.mxu1 %vm247_vm1, %v1688_v28  ;;  %v1689_v15 = vcombine.low %v2316_v41, %v2322_v34  ;;  %v532_v30 = vshll.u32 %v181_v19, 16  ;;  %v539_v39 = vrot.slane %v537_v52, 4  ;;  %v542_v26 = vrot.slane %v540_v56, 5 }
  0x35   : > { %1879 = vmatmul.mubr.msk.bf16.gmra.mrb[4].mxu0 %vm247_vm1, %v1718_v33  ;;  %v546_v53 = vshll.u32 %v183_v29, 16  ;;  %v553_v31 = vrot.slane %v551_v13, 4  ;;  %v556_v59 = vrot.slane %v554_v14, 5  ;;  %v529_v4 = vor.u32 %v528_v55, %v525_v37  ;;  %v2020_v33 = vld [vmem:[%s2088_s25 + $0x108] ss:$8 sps:$4 sm:$0xff]  }
  0x36   : > { %1884 = vmatprep.mubr.msk.bf16.mxu0 %vm247_vm1, %v1724_v25  ;;  %v534_v5 = vrot.slane %v532_v30, 5  ;;  %v560_v61 = vshll.u32 %v185_v8, 16  ;;  %v567_v6 = vrot.slane %v565_v12, 4  ;;  %1845 = vmatmul.mubr.msk.bf16.vlgmr.msra.gmra.mrb[0].mxu1 %vm247_vm1, %v1689_v15  ;;  %v543_v51 = vor.u32 %v542_v26, %v539_v39 }
  0x37   : > { %v548_v9 = vrot.slane %v546_v53, 5  ;;  %v557_v52 = vor.u32 %v556_v59, %v553_v31  ;;  %v570_v42 = vrot.slane %v568_v50, 5  ;;  %1853 = vmatpush3.bf16.msra.mxu1 %v2155_v45  ;;  %v530_v24 = vrot.slane %v529_v4, 4 }
  0x38   : > { %v562_v56 = vrot.slane %v560_v61, 5  ;;  %v574_v16 = vshll.u32 %v187_v47, 16  ;;  %v1725_v13 = vcombine.low %v2111_v22, %v2128_v35  ;;  %v544_v14 = vrot.slane %v543_v51, 4  ;;  %1983 = vmatprep.subr.msk.bf16.mxu1 %vm260_vm0, %v2063_v1  ;;  %v1741_v1 = vld [vmem:[%s2419_s1 + $0x10] sm:$0x3] }
  0x39   : > { %v558_v17 = vrot.slane %v557_v52, 4  ;;  %v571_v18 = vor.u32 %v570_v42, %v567_v6  ;;  %v1726_v12 = vcombine.low %v2131_v36, %v2137_v38  ;;  %v535_v43 = vsel %vm2199_vm4, %v530_v24, %v534_v5  ;;  %v1750_v47 = vld [vmem:[%s2420_s2] ss:$0 sm:$0xff] }
  0x3a   : > { %v576_v45 = vrot.slane %v574_v16, 5  ;;  %v1311_v2 = vsel %vm260_vm0, %v2259_v40, 0  ;;  %v549_v22 = vsel %vm2199_vm4, %v544_v14, %v548_v9  ;;  %v1697_v38 = vcombine.low %v2162_v48, %v2173_v54  ;;  %v188_v40 = vld [vmem:[%s2088_s25 + $0x40] sm:$0xf] }
  0x3b   : > { %v563_v35 = vsel %vm2199_vm4, %v558_v17, %v562_v56  ;;  %v572_v19 = vrot.slane %v571_v18, 4  ;;  %v1690_v21 = vcombine.low %v535_v43, %v549_v22  ;;  %v1727_v28 = vcombine.low %v2150_v44, %v188_v40 }
  0x3c   : > { %v1733_v29 = vcombine.low %v2206_v27, %v2209_v32  ;;  %v1698_v48 = vcombine.low %v2184_v0, %v2190_v7  ;;  %v1699_v54 = vcombine.low %v2220_v60, %v2224_v62  ;;  %v1734_v44 = vcombine.low %v2212_v49, %v2251_v57  ;;  %v2019_v32 = vld [vmem:[%s2088_s25 + $0xf8] ss:$8 sps:$4 sm:$0xff]  }
  0x3d   : > { %1885 = vmatmul.mubr.msk.bf16.vlgmr.msra.gmra.mrb[0].mxu0 %vm247_vm1, %v1725_v13  ;;  %v577_v36 = vsel %vm2199_vm4, %v572_v19, %v576_v45  ;;  %1848 = vmatprep.mubr.msk.bf16.mxu1 %vm247_vm1, %v1690_v21  ;;  %v1735_v0 = vcombine.low %v2254_v58, %v2265_v63  ;;  %v1436_v7 = vsel %vm260_vm0, %v1741_v1, 0  ;;  %v1700_v27 = vcombine.low %v2232_v10, %v2240_v23  ;;  %v189_v23 = vld [vmem:[%s2088_s25 + $0x44] sm:$0x1] }
  0x3e   : > { %1893 = vmatpush3.bf16.msra.mxu0 %v1311_v2  ;;  %1888 = vmatprep.mubr.msk.bf16.mxu0 %vm247_vm1, %v1726_v12  ;;  %v1691_v25 = vcombine.low %v563_v35, %v577_v36  ;;  %v1403_v60 = vshrl.u32 %v188_v40, 16  ;;  %v1406_v62 = vshll.u32 %v188_v40, 16  ;;  %v1742_v10 = vcombine.low %v2305_v46, %v2316_v41 }
  0x3f   : > { %1987 = vmatprep.subr.msk.bf16.mxu0 %vm260_vm0, %v1741_v1  ;;  %v1412_v50 = vshll.u32 %v189_v23, 16  ;;  %v1743_v37 = vcombine.low %v2322_v34, %v535_v43  ;;  %v1744_v8 = vcombine.low %v549_v22, %v563_v35 }
  0x40   : > { %1849 = vmatmul.mubr.msk.bf16.gmra.mrb[4].mxu1 %vm247_vm1, %v1691_v25  ;;  %v1405_v57 = vrot.slane %v1403_v60, 4  ;;  %v1408_v58 = vrot.slane %v1406_v62, 5 }
  0x41   : > { %1854 = vmatprep.mubr.msk.bf16.mxu1 %vm247_vm1, %v1697_v38 }
  0x42   : > { %v1409_v63 = vor.u32 %v1408_v58, %v1405_v57 }
  0x44   : > { %v1410_v15 = vrot.slane %v1409_v63, 4 }
  0x45   : > { %1889 = vmatmul.mubr.msk.bf16.gmra.mrb[4].mxu0 %vm247_vm1, %v1727_v28 }
  0x46   : > { %1894 = vmatprep.mubr.msk.bf16.mxu0 %vm247_vm1, %v1733_v29 }
  0x48   : > { %1855 = vmatmul.mubr.msk.bf16.vlgmr.msra.gmra.mrb[0].mxu1 %vm247_vm1, %v1698_v48 }
  0x49   : > { %1913 = vmatpush3.bf16.msra.mxu1 %v2071_v3  ;;  %1858 = vmatprep.mubr.msk.bf16.mxu1 %vm247_vm1, %v1699_v54  ;;  %v1645_v3 = vld [vmem:[%s2088_s25 + $0x88] sm:$0xf] }
  0x4a   : > { %v1736_v49 = vcombine.low %v2269_v11, %v1645_v3  ;;  %v1414_v11 = vrot.slane %v1412_v50, 5 }
  0x4c   : > { %v1415_v46 = vsel %vm2199_vm4, %v1410_v15, %v1414_v11 }
  0x4d   : > { %1895 = vmatmul.mubr.msk.bf16.vlgmr.msra.gmra.mrb[0].mxu0 %vm247_vm1, %v1734_v44  ;;  %v1745_v41 = vcombine.low %v577_v36, %v1415_v46 }
  0x4e   : > { %1903 = vmatpush3.bf16.msra.mxu0 %v1436_v7  ;;  %1898 = vmatprep.mubr.msk.bf16.mxu0 %vm247_vm1, %v1735_v0 }
  0x50   : > { %1859 = vmatmul.mubr.msk.bf16.gmra.mrb[4].mxu1 %vm247_vm1, %v1700_v27 }
  0x51   : > { %1868 = vmatprep.mubr.msk.bf16.mxu1 %vm247_vm1, %v2019_v32 }
  0x55   : > { %1899 = vmatmul.mubr.msk.bf16.gmra.mrb[4].mxu0 %vm247_vm1, %v1736_v49 }
  0x56   : > { %1904 = vmatprep.mubr.msk.bf16.mxu0 %vm247_vm1, %v1742_v10 }
  0x5c   : > { %1869 = vmatmul.mubr.msk.bf16.vlgmr.msra.gmra.mrb[4].mxu1 %vm247_vm1, %v2020_v33 }
  0x5d   : > { %1905 = vmatmul.mubr.msk.bf16.vlgmr.msra.gmra.mrb[0].mxu0 %vm247_vm1, %v1743_v37 }
  0x5e   : > { %1908 = vmatprep.mubr.msk.bf16.mxu0 %vm247_vm1, %v1744_v8 }
  0x65   : > { %1909 = vmatmul.mubr.msk.bf16.gmra.mrb[4].mxu0 %vm247_vm1, %v1745_v41 }
 0x11b   : > { %v1856_v55 = vpop.f32.mrb[0].mxu1 }
 0x11c   : > { %v767_v30 = vpop.f32.mrb[1].mxu1 }
 0x11d   : > { %v1857_v39 = vpop.f32.mrb[2].mxu1 }
 0x11e   : > { %v770_v26 = vpop.f32.mrb[3].mxu1 }
 0x12f   : > { %v1870_v34 = vpop.f32.mrb[4].mxu1 }
 0x130   : > { %v1906_v53 = vpop.f32.mrb[0].mxu0  ;;  %v909_v31 = vpop.f32.mrb[5].mxu1 }
 0x131   : > { %v1914_v59 = vadd.f32 %v1906_v53, %v1856_v55  ;;  %v1472_v4 = vpop.f32.mrb[1].mxu0  ;;  %v1871_v5 = vpop.f32.mrb[6].mxu1 }
 0x132   : > { %v1915_v20 = vadd.f32 %v1472_v4, %v767_v30  ;;  %v1907_v61 = vpop.f32.mrb[2].mxu0  ;;  %v912_v6 = vpop.f32.mrb[7].mxu1 }
 0x133   : > { %v1544_v51 = vadd.f32 %v1914_v59, %v1750_v47  ;;  %v1916_v9 = vadd.f32 %v1907_v61, %v1857_v39  ;;  %v1475_v52 = vpop.f32.mrb[3].mxu0 }
 0x134   : > { %v1542_v42 = vadd.f32 %v1915_v20, %v1750_v47  ;;  %v1917_v24 = vadd.f32 %v1475_v52, %v770_v26 }
 0x135   : > { %v1545_v56 = vadd.f32 %v1916_v9, %v1750_v47  ;;  %v1552_v13 = vmax.f32 %v1544_v51, 0.0 }
 0x136   : > { %v1543_v16 = vadd.f32 %v1917_v24, %v1750_v47  ;;  %v1550_v17 = vmax.f32 %v1542_v42, 0.0 }
 0x137   : > { %v1553_v14 = vmax.f32 %v1545_v56, 0.0 }
 0x138   : > { %v1551_v18 = vmax.f32 %v1543_v16, 0.0  ;;  %v1910_v12 = vpop.f32.mrb[4].mxu0 }
 0x139   : > { %v1762_v43 = vpack.c.bf16 %v1553_v14, %v1552_v13  ;;  %v1918_v45 = vadd.f32 %v1910_v12, %v1870_v34  ;;  %v1488_v2 = vpop.f32.mrb[5].mxu0 }
 0x13a   : > { %v1757_v22 = vpack.c.bf16 %v1551_v18, %v1550_v17  ;;  %v1919_v35 = vadd.f32 %v1488_v2, %v909_v31  ;;  %v1911_v19 = vpop.f32.mrb[6].mxu0 }
 0x13b   : > { %1774 = vst [vmem:[%s170_s16 + $0x8] sm:$0xff] %v1762_v43   ;;  %v1548_v21 = vadd.f32 %v1918_v45, %v1750_v47  ;;  %v1920_v1 = vadd.f32 %v1911_v19, %v1871_v5  ;;  %v1491_v36 = vpop.f32.mrb[7].mxu0 }
 0x13c   : > { %1758 = vst [vmem:[%s170_s16] sm:$0xff] %v1757_v22   ;;  %v1546_v38 = vadd.f32 %v1919_v35, %v1750_v47  ;;  %v1921_v40 = vadd.f32 %v1491_v36, %v912_v6 }
 0x13d   : > { %v1549_v25 = vadd.f32 %v1920_v1, %v1750_v47  ;;  %v1556_v29 = vmax.f32 %v1548_v21, 0.0 }
 0x13e   : > { %v1547_v28 = vadd.f32 %v1921_v40, %v1750_v47  ;;  %v1554_v54 = vmax.f32 %v1546_v38, 0.0 }
 0x13f   : > { %v1557_v48 = vmax.f32 %v1549_v25, 0.0 }
 0x140   : > { %v1555_v44 = vmax.f32 %v1547_v28, 0.0 }
 0x141   : > { %v1772_v0 = vpack.c.bf16 %v1557_v48, %v1556_v29 }
 0x142   : > { %v1767_v7 = vpack.c.bf16 %v1555_v44, %v1554_v54 }
 0x143   : > { %1776 = vst [vmem:[%s170_s16 + $0x18] sm:$0xff] %v1772_v0  }
 0x144   : > { %1775 = vst [vmem:[%s170_s16 + $0x10] sm:$0xff] %v1767_v7  }
 0x145 PF: > { %s13_s12 = sadd.s32 1, %s2027_s12  }
 0x146   : > { %p10_p4 = scmp.ge.s32.totalorder %s13_s12, 4  }
 0x148   :  { %12 = sbr.rel (!%p10_p4) target bundleno = 1 (0x1), region = 73 }

// kernel: basic_block_forward.3
= control target key start
LH: loop header
LB: loop body
LE: loop exit
PB: predicated region body
PF: predicated region fallthrough
CT: control target
= control target key end

     0   :  { %s2826_s15 = smov 0   ;;  %s3371_s0 = inlined_call_operand.vmem [shape: bf16[2,1,10,10,128], index: 0, kind: input, shape index: {}]   ;;  %s3372_s1 = inlined_call_operand.vmem [shape: bf16[9,128,128], index: 1, kind: input, shape index: {}]   ;;  %s3373_s2 = inlined_call_operand.vmem [shape: f32[1,128], index: 2, kind: input, shape index: {}]   ;;  %s3374_s3 = inlined_call_operand.vmem [shape: bf16[2,8,8,128], index: 3, kind: input, shape index: {}]   ;;  %s3375_s4 = inlined_call_operand.vmem [shape: f32[2,8,8,128], index: 4, kind: output, shape index: {}]  }
   0x1 LB: > { %s2028_s16 = sadd.s32 4294967295, %s2799_s15   ;;  %p2032_p0 = scmp.ge.s32.totalorder %s2799_s15, 1  ;;  %s2799_s15 = sphi %s2826_s15, %s14_s15  }
   0x2   : > { %p172_p1 = scmp.lt.s32.totalorder %s2799_s15, 3 }
   0x4   : > { %p173_p2 = pnand %p2032_p0, %p172_p1 }
   0x5   : > { %v2712_v0 = vld [vmem:[%s3372_s1] sm:$0xff] (!%p173_p2)   ;;  %p203_p3 = scmp.lt.s32.totalorder (!%p173_p2), %s2028_s16, 1  ;;  %v2714_v2 = vld [vmem:[%s3372_s1 + $0x8] sm:$0xff] (!%p173_p2)   ;;  %v2716_v4 = vld [vmem:[%s3372_s1 + $0x10] sm:$0xff] (!%p173_p2)   ;;  %vm400_vm0 = vsmask.f32 (!%p173_p2), 3328 }
   0x6   : > { %176 = sbr.rel (%p173_p2) target bundleno = 392 (0x188), region = 36  ;;  %v2713_v1 = vld [vmem:[%s3372_s1 + $0x100] sm:$0xff] (!%p173_p2)   ;;  %2407 = vmatprep.subr.bf16.mxu1 (!%p173_p2), %v2712_v0  ;;  %v2715_v3 = vld [vmem:[%s3372_s1 + $0x108] sm:$0xff] (!%p173_p2)   ;;  %v2717_v5 = vld [vmem:[%s3372_s1 + $0x110] sm:$0xff] (!%p173_p2)   ;;  %vm401_vm1 = vsmask.f32 (!%p173_p2), 7440 }
   0x7   : > { %2503 = vmatprep.subr.bf16.mxu0 (!%p173_p2), %v2713_v1  ;;  %2408 = vmatpush3.bf16.msra.mxu1 (!%p173_p2), %v2712_v0  ;;  %v2718_v6 = vld [vmem:[%s3372_s1 + $0x18] sm:$0xff] (!%p173_p2)   ;;  %v2720_v8 = vld [vmem:[%s3372_s1 + $0x20] sm:$0xff] (!%p173_p2)   ;;  %v2722_v10 = vld [vmem:[%s3372_s1 + $0x28] sm:$0xff] (!%p173_p2)   ;;  %vm693_vm3 = vcmask (!%p173_p2), 1042432   ;;  %vm694_vm4 = vcmask (!%p173_p2), 1046532  }
   0x8   : > { %2504 = vmatpush3.bf16.msra.mxu0 (!%p173_p2), %v2713_v1  ;;  %2409 = vmatprep.subr.bf16.mxu1 (!%p173_p2), %v2714_v2  ;;  %v2719_v7 = vld [vmem:[%s3372_s1 + $0x118] sm:$0xff] (!%p173_p2)   ;;  %v2721_v9 = vld [vmem:[%s3372_s1 + $0x120] sm:$0xff] (!%p173_p2)   ;;  %v2723_v13 = vld [vmem:[%s3372_s1 + $0x128] sm:$0xff] (!%p173_p2)  }
   0x9   : > { %2505 = vmatprep.subr.bf16.mxu0 (!%p173_p2), %v2715_v3  ;;  %v2724_v17 = vld [vmem:[%s3372_s1 + $0x30] sm:$0xff] (!%p173_p2)   ;;  %v2726_v29 = vld [vmem:[%s3372_s1 + $0x38] sm:$0xff] (!%p173_p2)   ;;  %vm2934_vm2 = vmor (!%p173_p2), %vm400_vm0, %vm401_vm1 }
   0xa   : > { %v2725_v24 = vld [vmem:[%s3372_s1 + $0x130] sm:$0xff] (!%p173_p2)   ;;  %v2727_v34 = vld [vmem:[%s3372_s1 + $0x138] sm:$0xff] (!%p173_p2)   ;;  %v2729_v56 = vld [vmem:[%s3372_s1 + $0x40] sm:$0xff] (!%p173_p2)  }
   0xb   : > { %2410 = vmatpush3.bf16.msra.mxu1 (!%p173_p2), %v2714_v2  ;;  %v2730_v59 = vld [vmem:[%s3372_s1 + $0x140] sm:$0xff] (!%p173_p2)   ;;  %vm3060_vm5 = vmor (!%p173_p2), %vm693_vm3, %vm694_vm4 }
   0xc   : > { %2506 = vmatpush3.bf16.msra.mxu0 (!%p173_p2), %v2715_v3  ;;  %2411 = vmatprep.subr.bf16.mxu1 (!%p173_p2), %v2716_v4  ;;  %v2756_v47 = vld [vmem:[%s3372_s1 + $0xa0] sm:$0xff] (!%p173_p2)  }
   0xd   : > { %s3381_s16 = smov (!%p203_p3, %s2028_s16), 1  ;;  %2507 = vmatprep.subr.bf16.mxu0 %v2717_v5 }
   0xe   : > { %s2703_s7 = smul.u32 80, %s3381_s16  ;;  %s2278_s22 = sshll.u32 %s3381_s16, 5 }
   0xf   : > { %2412 = vmatpush3.bf16.msra.mxu1 %v2716_v4  ;;  %s212_s25 = scalar_lea.vmem %s3374_s3, %s2278_s22  ;;  %s2279_s28 = sshll.u32 %s3381_s16, 6 }
  0x10   : > { %2508 = vmatpush3.bf16.msra.mxu0 %v2717_v5  ;;  %2413 = vmatprep.subr.bf16.mxu1 %v2718_v6  ;;  %s2870_s14 = scalar_lea.vmem %s3371_s0, %s2703_s7  ;;  %s3358_s5 = scalar_lea.vmem %s3375_s4, %s2279_s28 }
  0x11   : > { %2509 = vmatprep.subr.bf16.mxu0 %v2719_v7  ;;  %v2876_v11 = vld [vmem:[%s2870_s14] sm:$0xf]  ;;  %v2879_v12 = vld [vmem:[%s2870_s14 + $0x8] sm:$0xf]  ;;  %v2892_v18 = vld [vmem:[%s2870_s14 + $0x10] sm:$0xf] }
  0x12   : > { %v2038_v14 = vcombine.low %v2876_v11, %v2879_v12  ;;  %v404_v15 = vshrl.u32 %v2876_v11, 16  ;;  %v407_v16 = vshll.u32 %v2876_v11, 16  ;;  %v2895_v21 = vld [vmem:[%s2870_s14 + $0xc] sm:$0x1]  ;;  %v2898_v22 = vld [vmem:[%s2870_s14 + $0x14] sm:$0x1]  ;;  %v2130_v23 = vcombine.low %v2879_v12, %v2892_v18 }
  0x13   : > { %2414 = vmatpush3.bf16.msra.mxu1 %v2718_v6  ;;  %v2906_v25 = vld [vmem:[%s2870_s14 + $0x4] sm:$0x1]  ;;  %v2909_v26 = vld [vmem:[%s2870_s14 + $0x18] sm:$0xf]  ;;  %v418_v27 = vshrl.u32 %v2879_v12, 16  ;;  %v421_v28 = vshll.u32 %v2879_v12, 16 }
  0x14   : > { %2510 = vmatpush3.bf16.msra.mxu0 %v2719_v7  ;;  %2415 = vmatprep.subr.bf16.mxu1 %v2720_v8  ;;  %v406_v19 = vrot.slane %v404_v15, 4  ;;  %v409_v20 = vrot.slane %v407_v16, 5  ;;  %v427_v30 = vshll.u32 %v2895_v21, 16  ;;  %v432_v31 = vshrl.u32 %v2892_v18, 16  ;;  %v2924_v35 = vld [vmem:[%s2870_s14 + $0x1c] sm:$0x1] }
  0x15   : > { %2511 = vmatprep.subr.bf16.mxu0 %v2721_v9  ;;  %2423 = vmatprep.mubr.bf16.mxu1 %v2038_v14  ;;  %v435_v32 = vshll.u32 %v2892_v18, 16  ;;  %v441_v33 = vshll.u32 %v2898_v22, 16  ;;  %v420_v37 = vrot.slane %v418_v27, 4  ;;  %v423_v38 = vrot.slane %v421_v28, 5  ;;  %v2928_v43 = vld [vmem:[%s2870_s14 + $0x20] sm:$0xf] }
  0x16   : > { %v410_v36 = vor.u32 %v409_v20, %v406_v19  ;;  %v413_v39 = vshll.u32 %v2906_v25, 16  ;;  %v429_v40 = vrot.slane %v427_v30, 5  ;;  %v434_v41 = vrot.slane %v432_v31, 4  ;;  %v2940_v51 = vld [vmem:[%s2870_s14 + $0x24] sm:$0x1]  ;;  %v2734_v20 = vld [vmem:[%s3372_s1 + $0x50] sm:$0xff]  }
  0x17   : > { %2416 = vmatpush3.bf16.msra.mxu1 %v2720_v8  ;;  %v437_v42 = vrot.slane %v435_v32, 5  ;;  %v424_v44 = vor.u32 %v423_v38, %v420_v37  ;;  %v446_v45 = vshrl.u32 %v2909_v26, 16  ;;  %v449_v46 = vshll.u32 %v2909_v26, 16  ;;  %v2733_v28 = vld [vmem:[%s3372_s1 + $0x148] sm:$0xff]   ;;  %v2736_v30 = vld [vmem:[%s3372_s1 + $0x58] sm:$0xff]  }
  0x18   : > { %2512 = vmatpush3.bf16.msra.mxu0 %v2721_v9  ;;  %2417 = vmatprep.subr.bf16.mxu1 %v2722_v10  ;;  %v443_v49 = vrot.slane %v441_v33, 5  ;;  %v455_v50 = vshll.u32 %v2924_v35, 16  ;;  %v411_v52 = vrot.slane %v410_v36, 4  ;;  %v415_v57 = vrot.slane %v413_v39, 5  ;;  %v2732_v9 = vld [vmem:[%s3372_s1 + $0x48] sm:$0xff]  }
  0x19   : > { %2513 = vmatprep.subr.bf16.mxu0 %v2723_v13  ;;  %v438_v48 = vor.u32 %v437_v42, %v434_v41  ;;  %v425_v53 = vrot.slane %v424_v44, 4  ;;  %v448_v54 = vrot.slane %v446_v45, 4  ;;  %v451_v55 = vrot.slane %v449_v46, 5  ;;  %v2999_v32 = vld [vmem:[%s2870_s14 + $0x2c] sm:$0x1]  ;;  %v2735_v45 = vld [vmem:[%s3372_s1 + $0x150] sm:$0xff]  }
  0x1a   : > { %v460_v60 = vshrl.u32 %v2928_v43, 16  ;;  %v463_v61 = vshll.u32 %v2928_v43, 16  ;;  %v457_v0 = vrot.slane %v455_v50, 5  ;;  %v469_v1 = vshll.u32 %v2940_v51, 16  ;;  %v3003_v36 = vld [vmem:[%s2870_s14 + $0x30] sm:$0xf] }
  0x1b   : > { %2418 = vmatpush3.bf16.msra.mxu1 %v2722_v10  ;;  %v439_v58 = vrot.slane %v438_v48, 4  ;;  %v430_v62 = vsel %vm2934_vm2, %v425_v53, %v429_v40  ;;  %v452_v63 = vor.u32 %v451_v55, %v448_v54  ;;  %v2959_v3 = vcombine.low %v2892_v18, %v2909_v26  ;;  %v3006_v37 = vld [vmem:[%s2870_s14 + $0x34] sm:$0x1] }
  0x1c   : > { %2514 = vmatpush3.bf16.msra.mxu0 %v2723_v13  ;;  %2419 = vmatprep.subr.bf16.mxu1 %v2724_v17  ;;  %v462_v4 = vrot.slane %v460_v60, 4  ;;  %v465_v5 = vrot.slane %v463_v61, 5  ;;  %v471_v8 = vrot.slane %v469_v1, 5  ;;  %v2131_v10 = vcombine.low %v2909_v26, %v2928_v43  ;;  %v3032_v60 = vld [vmem:[%s2870_s14 + $0x3c] sm:$0x1] }
  0x1d   : > { %2515 = vmatprep.subr.bf16.mxu0 %v2725_v24  ;;  %v2955_v2 = vsel %vm2934_vm2, %v439_v58, %v443_v49  ;;  %v453_v6 = vrot.slane %v452_v63, 4  ;;  %v416_v16 = vsel %vm2934_vm2, %v411_v52, %v415_v57  ;;  %v483_v39 = vshll.u32 %v2999_v32, 16  ;;  %v2737_v57 = vld [vmem:[%s3372_s1 + $0x158] sm:$0xff]   ;;  %v3035_v61 = vld [vmem:[%s2870_s14 + $0x40] sm:$0xf] }
  0x1e   : > { %v2158_v7 = vcombine.low %v430_v62, %v2955_v2  ;;  %v466_v13 = vor.u32 %v465_v5, %v462_v4  ;;  %v488_v41 = vshrl.u32 %v3003_v36, 16  ;;  %v491_v42 = vshll.u32 %v3003_v36, 16  ;;  %v2738_v63 = vld [vmem:[%s3372_s1 + $0x60] sm:$0xff]  }
  0x1f   : > { %2420 = vmatpush3.bf16.msra.mxu1 %v2724_v17  ;;  %v2969_v14 = vsel %vm2934_vm2, %v453_v6, %v457_v0  ;;  %v702_v17 = vrot.slane %v2895_v21, 5  ;;  %v497_v44 = vshll.u32 %v3006_v37, 16  ;;  %v2079_v48 = vrot.slane %v2879_v12, 9  ;;  %v2741_v21 = vld [vmem:[%s3372_s1 + $0x168] sm:$0xff]  }
  0x20   : > { %2516 = vmatpush3.bf16.msra.mxu0 %v2725_v24  ;;  %2421 = vmatprep.subr.bf16.mxu1 %v2726_v29  ;;  %v467_v15 = vrot.slane %v466_v13, 4  ;;  %v706_v24 = vrot.slane %v2898_v22, 5  ;;  %v2080_v49 = vrot.slane %v2892_v18, 9  ;;  %v485_v52 = vrot.slane %v483_v39, 5  ;;  %v2774_v12 = vld [vmem:[%s3372_s1 + $0xe8] sm:$0xff]   ;;  %v2773_v18 = vld [vmem:[%s3372_s1 + $0x1e0] sm:$0xff]  }
  0x21   : > { %2517 = vmatprep.subr.bf16.mxu0 %v2727_v34  ;;  %2519 = vmatprep.mubr.bf16.mxu0 %v2158_v7  ;;  %v490_v53 = vrot.slane %v488_v41, 4  ;;  %v493_v54 = vrot.slane %v491_v42, 5  ;;  %v499_v55 = vrot.slane %v497_v44, 5  ;;  %v511_v5 = vshll.u32 %v3032_v60, 16  ;;  %v2755_v41 = vld [vmem:[%s3372_s1 + $0x198] sm:$0xff]  }
  0x22   : > { %v2977_v19 = vsel %vm2934_vm2, %v467_v15, %v471_v8  ;;  %v1063_v7 = vshrl.u32 %v3035_v61, 16  ;;  %v1066_v8 = vshll.u32 %v3035_v61, 16 }
  0x23   : > { %2422 = vmatpush3.bf16.msra.mxu1 %v2726_v29  ;;  %v2159_v27 = vcombine.low %v2969_v14, %v2977_v19  ;;  %v2989_v29 = vld [vmem:[%s2870_s14 + $0x28] sm:$0xf]  ;;  %v494_v0 = vor.u32 %v493_v54, %v490_v53  ;;  %v3081_v54 = vsel %vm3060_vm5, %v2080_v49, %v706_v24  ;;  %v710_v49 = vrot.slane %v2924_v35, 5  ;;  %v2748_v35 = vld [vmem:[%s3372_s1 + $0x80] sm:$0xff]  }
  0x24   : > { %2518 = vmatpush3.bf16.msra.mxu0 %v2727_v34  ;;  %2431 = vmatprep.subr.bf16.mxu1 %v2729_v56  ;;  %v2996_v31 = vcombine.low %v2928_v43, %v2989_v29  ;;  %v474_v33 = vshrl.u32 %v2989_v29, 16  ;;  %v2066_v34 = vcombine.low %v416_v16, %v430_v62  ;;  %v477_v38 = vshll.u32 %v2989_v29, 16  ;;  %v3038_v62 = vld [vmem:[%s2870_s14 + $0x44] sm:$0x1] }
  0x25   : > { %2527 = vmatprep.subr.bf16.mxu0 %v2730_v59  ;;  %v2132_v50 = vcombine.low %v2989_v29, %v3003_v36  ;;  %v495_v13 = vrot.slane %v494_v0, 4  ;;  %v1068_v39 = vrot.slane %v1066_v8, 5  ;;  %v2744_v0 = vld [vmem:[%s3372_s1 + $0x170] sm:$0xff]   ;;  %v2084_v8 = vrot.slane %v3003_v36, 9 }
  0x26   : > { %2424 = vmatmul.mubr.bf16.vlgmr.msra.gmra.mrb[0].mxu1 %v2959_v3  ;;  %v476_v40 = vrot.slane %v474_v33, 4  ;;  %v479_v46 = vrot.slane %v477_v38, 5  ;;  %v1065_v38 = vrot.slane %v1063_v7, 4  ;;  %v1242_v7 = vrot.slane %v3038_v62, 5 }
  0x27   : > { %2432 = vmatpush3.bf16.msra.mxu1 %v2729_v56  ;;  %2520 = vmatmul.mubr.bf16.vlgmr.msra.gmra.mrb[0].mxu0 %v2159_v27  ;;  %v3022_v56 = vld [vmem:[%s2870_s14 + $0x38] sm:$0xf]  ;;  %v2739_v27 = vld [vmem:[%s3372_s1 + $0x160] sm:$0xff]  }
  0x28   : > { %2433 = vmatprep.subr.bf16.mxu1 %v2732_v9  ;;  %2528 = vmatpush3.bf16.msra.mxu0 %v2730_v59  ;;  %v480_v58 = vor.u32 %v479_v46, %v476_v40  ;;  %v3029_v59 = vcombine.low %v3003_v36, %v3022_v56  ;;  %v502_v1 = vshrl.u32 %v3022_v56, 16  ;;  %v505_v4 = vshll.u32 %v3022_v56, 16  ;;  %v2792_v36 = vld [vmem:[%s3372_s1 + $0x238] sm:$0xff]  }
  0x29   : > { %2529 = vmatprep.subr.bf16.mxu0 %v2733_v28  ;;  %2427 = vmatprep.mubr.bf16.mxu1 %v2996_v31  ;;  %v1069_v44 = vor.u32 %v1068_v39, %v1065_v38  ;;  %v2133_v46 = vcombine.low %v3022_v56, %v3035_v61  ;;  %v698_v39 = vrot.slane %v2906_v25, 5 }
  0x2a   : > { %v481_v6 = vrot.slane %v480_v58, 4  ;;  %v504_v15 = vrot.slane %v502_v1, 4  ;;  %v507_v16 = vrot.slane %v505_v4, 5  ;;  %v2747_v1 = vld [vmem:[%s3372_s1 + $0x178] sm:$0xff]   ;;  %v2083_v4 = vrot.slane %v2989_v29, 9  ;;  %v2791_v29 = vld [vmem:[%s3372_s1 + $0x230] sm:$0xff]  }
  0x2b   : > { %2434 = vmatpush3.bf16.msra.mxu1 %v2732_v9  ;;  %v1072_v9 = vshll.u32 %v3038_v62, 16  ;;  %v1070_v53 = vrot.slane %v1069_v44, 4 }
  0x2c   : > { %2435 = vmatprep.subr.bf16.mxu1 %v2734_v20  ;;  %2530 = vmatpush3.bf16.msra.mxu0 %v2733_v28  ;;  %v2740_v28 = vld [vmem:[%s3372_s1 + $0x68] sm:$0xff]   ;;  %v486_v33 = vsel %vm2934_vm2, %v481_v6, %v485_v52  ;;  %v2170_v6 = vrot.slane %v3035_v61, 9 }
  0x2d   : > { %2531 = vmatprep.subr.bf16.mxu0 %v2735_v45  ;;  %v1074_v40 = vrot.slane %v1072_v9, 5  ;;  %v722_v9 = vrot.slane %v3006_v37, 5  ;;  %v2750_v37 = vld [vmem:[%s3372_s1 + $0x88] sm:$0xff]  }
  0x2e   : > { %2428 = vmatmul.mubr.bf16.gmra.mrb[4].mxu1 %v3029_v59 }
  0x2f   : > { %2436 = vmatpush3.bf16.msra.mxu1 %v2734_v20  ;;  %v513_v20 = vrot.slane %v511_v5, 5  ;;  %2447 = vmatprep.mubr.bf16.mxu1 %v2066_v34  ;;  %v508_v34 = vor.u32 %v507_v16, %v504_v15  ;;  %v3095_v22 = vsel %vm2934_vm2, %v1070_v53, %v1074_v40  ;;  %v718_v5 = vrot.slane %v2999_v32, 5  ;;  %v238_v15 = vld [vmem:[%s2870_s14 + $0x4c] sm:$0x1]  ;;  %v2752_v53 = vld [vmem:[%s3372_s1 + $0x90] sm:$0xff]  }
  0x30   : > { %2437 = vmatprep.subr.bf16.mxu1 %v2736_v30  ;;  %2532 = vmatpush3.bf16.msra.mxu0 %v2735_v45  ;;  %v3075_v45 = vsel %vm3060_vm5, %v2079_v48, %v702_v17  ;;  %v2078_v48 = vrot.slane %v2876_v11, 9  ;;  %v2081_v11 = vrot.slane %v2909_v26, 9  ;;  %v3130_v16 = vcombine.low %v2955_v2, %v2969_v14  ;;  %v2788_v26 = vld [vmem:[%s3372_s1 + $0x218] sm:$0xff]  }
  0x31   : > { %2533 = vmatprep.subr.bf16.mxu0 %v2737_v57  ;;  %v509_v52 = vrot.slane %v508_v34, 4  ;;  %v2187_v24 = vcombine.low %v3075_v45, %v3081_v54  ;;  %v3150_v14 = vsel %vm3060_vm5, %v2170_v6, %v1242_v7  ;;  %v3170_v25 = vsel %vm3060_vm5, %v2084_v8, %v722_v9  ;;  %v2759_v6 = vld [vmem:[%s3372_s1 + $0x1a8] sm:$0xff]   ;;  %v2762_v7 = vld [vmem:[%s3372_s1 + $0xb8] sm:$0xff]   ;;  %v2764_v8 = vld [vmem:[%s3372_s1 + $0xc0] sm:$0xff]  }
  0x32   : > { %v2763_v9 = vld [vmem:[%s3372_s1 + $0x1b8] sm:$0xff]  }
  0x33   : > { %2438 = vmatpush3.bf16.msra.mxu1 %v2736_v30  ;;  %v3066_v30 = vsel %vm2934_vm2, %v495_v13, %v499_v55  ;;  %v2743_v55 = vld [vmem:[%s3372_s1 + $0x70] sm:$0xff]   ;;  %v3088_v58 = vsel %vm2934_vm2, %v509_v52, %v513_v20  ;;  %v3125_v13 = vld [vmem:[%s2870_s14 + $0x48] sm:$0xf]  ;;  %v1739_v20 = vrot.slane %v238_v15, 5 }
  0x34   : > { %2439 = vmatprep.subr.bf16.mxu1 %v2738_v63  ;;  %v2160_v42 = vcombine.low %v486_v33, %v3066_v30  ;;  %2534 = vmatpush3.bf16.msra.mxu0 %v2737_v57  ;;  %v2161_v17 = vcombine.low %v3088_v58, %v3095_v22  ;;  %v714_v57 = vrot.slane %v2940_v51, 5  ;;  %v2082_v51 = vrot.slane %v2928_v43, 9  ;;  %v2789_v43 = vld [vmem:[%s3372_s1 + $0x220] sm:$0xff]  }
  0x35   : > { %2535 = vmatprep.subr.bf16.mxu0 %v2739_v27  ;;  %v2249_v32 = vrot.slane %v3125_v13, 9  ;;  %v1566_v2 = vshrl.u32 %v3125_v13, 16  ;;  %v1569_v40 = vshll.u32 %v3125_v13, 16 }
  0x36   : > { %2523 = vmatprep.mubr.bf16.mxu0 %v2160_v42  ;;  %v3139_v62 = vsel %vm3060_vm5, %v2082_v51, %v714_v57  ;;  %v3166_v42 = vsel %vm3060_vm5, %v2083_v4, %v718_v5  ;;  %v2751_v57 = vld [vmem:[%s3372_s1 + $0x188] sm:$0xff]   ;;  %v2757_v4 = vld [vmem:[%s3372_s1 + $0x1a0] sm:$0xff]   ;;  %v2760_v5 = vld [vmem:[%s3372_s1 + $0xb0] sm:$0xff]  }
  0x37   : > { %2440 = vmatpush3.bf16.msra.mxu1 %v2738_v63  ;;  %v2746_v63 = vld [vmem:[%s3372_s1 + $0x78] sm:$0xff]   ;;  %2524 = vmatmul.mubr.bf16.gmra.mrb[4].mxu0 %v2161_v17  ;;  %v3154_v38 = vsel %vm3060_vm5, %v2249_v32, %v1739_v20  ;;  %v1568_v34 = vrot.slane %v1566_v2, 4  ;;  %v1571_v44 = vrot.slane %v1569_v40, 5  ;;  %v726_v17 = vrot.slane %v3032_v60, 5  ;;  %v2766_v20 = vld [vmem:[%s3372_s1 + $0xc8] sm:$0xff]   ;;  %v2772_v40 = vld [vmem:[%s3372_s1 + $0xe0] sm:$0xff]  }
  0x38   : > { %2441 = vmatprep.subr.bf16.mxu1 %v2740_v28  ;;  %2536 = vmatpush3.bf16.msra.mxu0 %v2739_v27  ;;  %v3135_v27 = vsel %vm3060_vm5, %v2081_v11, %v710_v49  ;;  %v3189_v11 = vcombine.low %v3066_v30, %v3088_v58  ;;  %v2753_v30 = vld [vmem:[%s3372_s1 + $0x190] sm:$0xff]   ;;  %v3244_v32 = vcombine.low %v3139_v62, %v3166_v42  ;;  %v2770_v2 = vld [vmem:[%s3372_s1 + $0xd8] sm:$0xff]  }
  0x39   : > { %2537 = vmatprep.subr.bf16.mxu0 %v2741_v21  ;;  %2543 = vmatprep.mubr.bf16.mxu0 %v2187_v24  ;;  %v2188_v52 = vcombine.low %v3135_v27, %v3139_v62  ;;  %v699_v24 = vsel %vm3060_vm5, %v2078_v48, %v698_v39  ;;  %v1572_v49 = vor.u32 %v1571_v44, %v1568_v34  ;;  %v2754_v48 = vld [vmem:[%s3372_s1 + $0x98] sm:$0xff]   ;;  %v2769_v39 = vld [vmem:[%s3372_s1 + $0x1d0] sm:$0xff]   ;;  %v2783_v34 = vld [vmem:[%s3372_s1 + $0x200] sm:$0xff]  }
  0x3a   : > { %v2102_v60 = vcombine.low %v699_v24, %v3075_v45  ;;  %v2787_v44 = vld [vmem:[%s3372_s1 + $0x210] sm:$0xff]  }
  0x3b   : > { %2442 = vmatpush3.bf16.msra.mxu1 %v2740_v28  ;;  %v3145_v28 = vcombine.low %v2977_v19, %v486_v33  ;;  %v2749_v19 = vld [vmem:[%s3372_s1 + $0x180] sm:$0xff]   ;;  %v2266_v33 = vcombine.low %v3150_v14, %v3154_v38 }
  0x3c   : > { %2443 = vmatprep.subr.bf16.mxu1 %v2743_v55  ;;  %2538 = vmatpush3.bf16.msra.mxu0 %v2741_v21  ;;  %v2085_v21 = vrot.slane %v3022_v56, 9 }
  0x3d   : > { %2539 = vmatprep.subr.bf16.mxu0 %v2744_v0 }
  0x3e   : > { %v727_v51 = vsel %vm3060_vm5, %v2085_v21, %v726_v17 }
  0x3f   : > { %2444 = vmatpush3.bf16.msra.mxu1 %v2743_v55  ;;  %v1575_v55 = vshll.u32 %v238_v15, 16  ;;  %v2190_v58 = vcombine.low %v727_v51, %v3150_v14  ;;  %v3240_v15 = vcombine.low %v3081_v54, %v3135_v27  ;;  %v2768_v54 = vld [vmem:[%s3372_s1 + $0xd0] sm:$0xff]   ;;  %v2767_v27 = vld [vmem:[%s3372_s1 + $0x1c8] sm:$0xff]   ;;  %v3261_v62 = vcombine.low %v3170_v25, %v727_v51 }
  0x40   : > { %2445 = vmatprep.subr.bf16.mxu1 %v2746_v63  ;;  %2540 = vmatpush3.bf16.msra.mxu0 %v2744_v0 }
  0x41   : > { %2541 = vmatprep.subr.bf16.mxu0 %v2747_v1  ;;  %v1577_v0 = vrot.slane %v1575_v55, 5 }
  0x43   : > { %2446 = vmatpush3.bf16.msra.mxu1 %v2746_v63  ;;  %v2189_v63 = vcombine.low %v3166_v42, %v3170_v25  ;;  %v2780_v42 = vld [vmem:[%s3372_s1 + $0x1f8] sm:$0xff]   ;;  %v2784_v25 = vld [vmem:[%s3372_s1 + $0x208] sm:$0xff]  }
  0x44   : > { %2455 = vmatprep.subr.bf16.mxu1 %v2748_v35  ;;  %2542 = vmatpush3.bf16.msra.mxu0 %v2747_v1 }
  0x45   : > { %2551 = vmatprep.subr.bf16.mxu0 %v2749_v19 }
  0x46   : > { %2448 = vmatmul.mubr.bf16.vlgmr.msra.gmra.mrb[0].mxu1 %v3130_v16 }
  0x47   : > { %2456 = vmatpush3.bf16.msra.mxu1 %v2748_v35  ;;  %2451 = vmatprep.mubr.bf16.mxu1 %v3145_v28  ;;  %v1573_v35 = vrot.slane %v1572_v49, 4 }
  0x48   : > { %2457 = vmatprep.subr.bf16.mxu1 %v2750_v37  ;;  %2544 = vmatmul.mubr.bf16.vlgmr.msra.gmra.mrb[0].mxu0 %v2188_v52 }
  0x49   : > { %2552 = vmatpush3.bf16.msra.mxu0 %v2749_v19  ;;  %v1578_v1 = vsel %vm2934_vm2, %v1573_v35, %v1577_v0  ;;  %2547 = vmatprep.mubr.bf16.mxu0 %v2189_v63  ;;  %v2779_v19 = vld [vmem:[%s3372_s1 + $0xf8] sm:$0xff]   ;;  %v2297_v0 = vld [vmem:[%s212_s25 + $0x10] sm:$0xff]  }
  0x4a   : > { %2553 = vmatprep.subr.bf16.mxu0 %v2751_v57  ;;  %v3203_v45 = vcombine.low %v3095_v22, %v1578_v1  ;;  %v2758_v22 = vld [vmem:[%s3372_s1 + $0xa8] sm:$0xff]  }
  0x4b   : > { %2458 = vmatpush3.bf16.msra.mxu1 %v2750_v37  ;;  %v2765_v37 = vld [vmem:[%s3372_s1 + $0x1c0] sm:$0xff]   ;;  %v2296_v1 = vld [vmem:[%s212_s25 + $0x8] sm:$0xff]  }
  0x4c   : > { %2459 = vmatprep.subr.bf16.mxu1 %v2752_v53 }
  0x4d   : > { %2554 = vmatpush3.bf16.msra.mxu0 %v2751_v57 }
  0x4e   : > { %2452 = vmatmul.mubr.bf16.gmra.mrb[4].mxu1 %v3189_v11  ;;  %2555 = vmatprep.subr.bf16.mxu0 %v2753_v30 }
  0x4f   : > { %2460 = vmatpush3.bf16.msra.mxu1 %v2752_v53  ;;  %2471 = vmatprep.mubr.bf16.mxu1 %v2102_v60 }
  0x50   : > { %2461 = vmatprep.subr.bf16.mxu1 %v2754_v48  ;;  %2548 = vmatmul.mubr.bf16.gmra.mrb[4].mxu0 %v2190_v58 }
  0x51   : > { %2556 = vmatpush3.bf16.msra.mxu0 %v2753_v30  ;;  %2567 = vmatprep.mubr.bf16.mxu0 %v2959_v3  ;;  %v2761_v3 = vld [vmem:[%s3372_s1 + $0x1b0] sm:$0xff]  }
  0x52   : > { %2557 = vmatprep.subr.bf16.mxu0 %v2755_v41 }
  0x53   : > { %2462 = vmatpush3.bf16.msra.mxu1 %v2754_v48 }
  0x54   : > { %2463 = vmatprep.subr.bf16.mxu1 %v2756_v47 }
  0x55   : > { %2558 = vmatpush3.bf16.msra.mxu0 %v2755_v41  ;;  %v2281_v41 = vld [vmem:[%s212_s25] sm:$0xff]  }
  0x56   : > { %2559 = vmatprep.subr.bf16.mxu0 %v2757_v4 }
  0x57   : > { %2464 = vmatpush3.bf16.msra.mxu1 %v2756_v47 }
  0x58   : > { %2465 = vmatprep.subr.bf16.mxu1 %v2758_v22 }
  0x59   : > { %2560 = vmatpush3.bf16.msra.mxu0 %v2757_v4 }
  0x5a   : > { %2561 = vmatprep.subr.bf16.mxu0 %v2759_v6 }
  0x5b   : > { %2466 = vmatpush3.bf16.msra.mxu1 %v2758_v22 }
  0x5c   : > { %2467 = vmatprep.subr.bf16.mxu1 %v2760_v5 }
  0x5d   : > { %2562 = vmatpush3.bf16.msra.mxu0 %v2759_v6 }
  0x5e   : > { %2563 = vmatprep.subr.bf16.mxu0 %v2761_v3 }
  0x5f   : > { %2468 = vmatpush3.bf16.msra.mxu1 %v2760_v5 }
  0x60   : > { %2469 = vmatprep.subr.bf16.mxu1 %v2762_v7 }
  0x61   : > { %2564 = vmatpush3.bf16.msra.mxu0 %v2761_v3  ;;  %v2291_v3 = vunpack.c.h.bf16 %v2297_v0 }
  0x62   : > { %2565 = vmatprep.subr.bf16.mxu0 %v2763_v9 }
  0x63   : > { %2470 = vmatpush3.bf16.msra.mxu1 %v2762_v7 }
  0x64   : > { %2479 = vmatprep.subr.bf16.mxu1 %v2764_v8 }
  0x65   : > { %2566 = vmatpush3.bf16.msra.mxu0 %v2763_v9  ;;  %v2286_v9 = vunpack.c.l.bf16 %v2296_v1 }
  0x66   : > { %2472 = vmatmul.mubr.bf16.vlgmr.msra.gmra.mrb[0].mxu1 %v3240_v15  ;;  %2575 = vmatprep.subr.bf16.mxu0 %v2765_v37 }
  0x67   : > { %2480 = vmatpush3.bf16.msra.mxu1 %v2764_v8  ;;  %2475 = vmatprep.mubr.bf16.mxu1 %v3244_v32 }
  0x68   : > { %2481 = vmatprep.subr.bf16.mxu1 %v2766_v20  ;;  %2568 = vmatmul.mubr.bf16.vlgmr.msra.gmra.mrb[0].mxu0 %v2996_v31  ;;  %v2215_v31 = vcombine.low %v3035_v61, %v3125_v13  ;;  %v2775_v13 = vld [vmem:[%s3372_s1 + $0x1e8] sm:$0xff]  }
  0x69   : > { %2576 = vmatpush3.bf16.msra.mxu0 %v2765_v37  ;;  %2571 = vmatprep.mubr.bf16.mxu0 %v3029_v59  ;;  %v2771_v59 = vld [vmem:[%s3372_s1 + $0x1d8] sm:$0xff]  }
  0x6a   : > { %2577 = vmatprep.subr.bf16.mxu0 %v2767_v27 }
  0x6b   : > { %2482 = vmatpush3.bf16.msra.mxu1 %v2766_v20 }
  0x6c   : > { %2483 = vmatprep.subr.bf16.mxu1 %v2768_v54 }
  0x6d   : > { %2578 = vmatpush3.bf16.msra.mxu0 %v2767_v27 }
  0x6e   : > { %2476 = vmatmul.mubr.bf16.gmra.mrb[4].mxu1 %v3261_v62  ;;  %2579 = vmatprep.subr.bf16.mxu0 %v2769_v39 }
  0x6f   : > { %2484 = vmatpush3.bf16.msra.mxu1 %v2768_v54  ;;  %2495 = vmatprep.mubr.bf16.mxu1 %v2130_v23  ;;  %v2776_v23 = vld [vmem:[%s3372_s1 + $0xf0] sm:$0xff]   ;;  %v2282_v54 = vunpack.c.l.bf16 %v2281_v41 }
  0x70   : > { %2485 = vmatprep.subr.bf16.mxu1 %v2770_v2  ;;  %2572 = vmatmul.mubr.bf16.gmra.mrb[4].mxu0 %v2215_v31 }
  0x71   : > { %2580 = vmatpush3.bf16.msra.mxu0 %v2769_v39  ;;  %2591 = vmatprep.mubr.bf16.mxu0 %v3130_v16  ;;  %v2778_v16 = vld [vmem:[%s3372_s1 + $0x1f0] sm:$0xff]  }
  0x72   : > { %2581 = vmatprep.subr.bf16.mxu0 %v2771_v59 }
  0x73   : > { %2486 = vmatpush3.bf16.msra.mxu1 %v2770_v2 }
  0x74   : > { %2487 = vmatprep.subr.bf16.mxu1 %v2772_v40 }
  0x75   : > { %2582 = vmatpush3.bf16.msra.mxu0 %v2771_v59 }
  0x76   : > { %2583 = vmatprep.subr.bf16.mxu0 %v2773_v18 }
  0x77   : > { %2488 = vmatpush3.bf16.msra.mxu1 %v2772_v40  ;;  %v2287_v40 = vunpack.c.h.bf16 %v2296_v1 }
  0x78   : > { %2489 = vmatprep.subr.bf16.mxu1 %v2774_v12 }
  0x79   : > { %2584 = vmatpush3.bf16.msra.mxu0 %v2773_v18 }
  0x7a   : > { %2585 = vmatprep.subr.bf16.mxu0 %v2775_v13 }
  0x7b   : > { %2490 = vmatpush3.bf16.msra.mxu1 %v2774_v12 }
  0x7c   : > { %2491 = vmatprep.subr.bf16.mxu1 %v2776_v23 }
  0x7d   : > { %2586 = vmatpush3.bf16.msra.mxu0 %v2775_v13 }
  0x7e   : > { %2587 = vmatprep.subr.bf16.mxu0 %v2778_v16 }
  0x7f   : > { %2492 = vmatpush3.bf16.msra.mxu1 %v2776_v23 }
  0x80   : > { %2493 = vmatprep.subr.bf16.mxu1 %v2779_v19 }
  0x81   : > { %2588 = vmatpush3.bf16.msra.mxu0 %v2778_v16 }
  0x82   : > { %2589 = vmatprep.subr.bf16.mxu0 %v2780_v42 }
  0x83   : > { %2494 = vmatpush3.bf16.msra.mxu1 %v2779_v19 }
  0x84   : > { %2623 = vmatprep.subr.bf16.mxu1 %v2783_v34 }
  0x85   : > { %2590 = vmatpush3.bf16.msra.mxu0 %v2780_v42 }
  0x86   : > { %2496 = vmatmul.mubr.bf16.vlgmr.msra.gmra.mrb[0].mxu1 %v2131_v10  ;;  %2599 = vmatprep.subr.bf16.mxu0 %v2783_v34  ;;  %v2790_v10 = vld [vmem:[%s3372_s1 + $0x228] sm:$0xff]  }
  0x87   : > { %2631 = vmatpush3.bf16.msra.mxu1 %v2783_v34  ;;  %2499 = vmatprep.mubr.bf16.mxu1 %v2132_v50 }
  0x88   : > { %2624 = vmatprep.subr.bf16.mxu1 %v2784_v25  ;;  %2592 = vmatmul.mubr.bf16.vlgmr.msra.gmra.mrb[0].mxu0 %v3145_v28 }
  0x89   : > { %2600 = vmatpush3.bf16.msra.mxu0 %v2783_v34  ;;  %2595 = vmatprep.mubr.bf16.mxu0 %v3189_v11  ;;  %v2275_v11 = vld [vmem:[%s3373_s2] ss:$0 sm:$0xff] }
  0x8a   : > { %2601 = vmatprep.subr.bf16.mxu0 %v2784_v25 }
  0x8b   : > { %2632 = vmatpush3.bf16.msra.mxu1 %v2784_v25 }
  0x8c   : > { %2625 = vmatprep.subr.bf16.mxu1 %v2787_v44 }
  0x8d   : > { %2602 = vmatpush3.bf16.msra.mxu0 %v2784_v25  ;;  %v2283_v25 = vunpack.c.h.bf16 %v2281_v41 }
  0x8e   : > { %2500 = vmatmul.mubr.bf16.gmra.mrb[4].mxu1 %v2133_v46  ;;  %2603 = vmatprep.subr.bf16.mxu0 %v2787_v44 }
  0x8f   : > { %2633 = vmatpush3.bf16.msra.mxu1 %v2787_v44  ;;  %2619 = vmatprep.mubr.bf16.mxu1 %v3261_v62 }
  0x90   : > { %2626 = vmatprep.subr.bf16.mxu1 %v2788_v26  ;;  %2596 = vmatmul.mubr.bf16.gmra.mrb[4].mxu0 %v3203_v45  ;;  %v2290_v45 = vunpack.c.l.bf16 %v2297_v0 }
  0x91   : > { %2604 = vmatpush3.bf16.msra.mxu0 %v2787_v44  ;;  %2615 = vmatprep.mubr.bf16.mxu0 %v3240_v15 }
  0x92   : > { %2605 = vmatprep.subr.bf16.mxu0 %v2788_v26 }
  0x93   : > { %2634 = vmatpush3.bf16.msra.mxu1 %v2788_v26 }
  0x94   : > { %2627 = vmatprep.subr.bf16.mxu1 %v2789_v43 }
  0x95   : > { %2606 = vmatpush3.bf16.msra.mxu0 %v2788_v26 }
  0x96   : > { %2607 = vmatprep.subr.bf16.mxu0 %v2789_v43 }
  0x97   : > { %2635 = vmatpush3.bf16.msra.mxu1 %v2789_v43 }
  0x98   : > { %2628 = vmatprep.subr.bf16.mxu1 %v2790_v10 }
  0x99   : > { %2608 = vmatpush3.bf16.msra.mxu0 %v2789_v43 }
  0x9a   : > { %2609 = vmatprep.subr.bf16.mxu0 %v2790_v10 }
  0x9b   : > { %2636 = vmatpush3.bf16.msra.mxu1 %v2790_v10 }
  0x9c   : > { %2629 = vmatprep.subr.bf16.mxu1 %v2791_v29 }
  0x9d   : > { %2610 = vmatpush3.bf16.msra.mxu0 %v2790_v10 }
  0x9e   : > { %2611 = vmatprep.subr.bf16.mxu0 %v2791_v29 }
  0x9f   : > { %2637 = vmatpush3.bf16.msra.mxu1 %v2791_v29 }
  0xa0   : > { %2630 = vmatprep.subr.bf16.mxu1 %v2792_v36 }
  0xa1   : > { %2612 = vmatpush3.bf16.msra.mxu0 %v2791_v29 }
  0xa2   : > { %2613 = vmatprep.subr.bf16.mxu0 %v2792_v36 }
  0xa3   : > { %2638 = vmatpush3.bf16.msra.mxu1 %v2792_v36 }
  0xa5   : > { %2614 = vmatpush3.bf16.msra.mxu0 %v2792_v36 }
  0xa6   : > { %2620 = vmatmul.mubr.bf16.vlgmr.msra.gmra.mrb[8].mxu1 %v2266_v33  ;;  %v2298_v33 = vld [vmem:[%s212_s25 + $0x18] sm:$0xff]  }
  0xa7   : > { %v2294_v48 = vunpack.c.l.bf16 %v2298_v33  ;;  %v2295_v4 = vunpack.c.h.bf16 %v2298_v33 }
  0xa8   : > { %2616 = vmatmul.mubr.bf16.vlgmr.msra.gmra.mrb[0].mxu0 %v3244_v32 }
 0x159   : > { %v2497_v50 = vpop.f32.mrb[0].mxu1 }
 0x15a   : > { %v1007_v56 = vpop.f32.mrb[1].mxu1 }
 0x15b   : > { %v2498_v61 = vpop.f32.mrb[2].mxu1 }
 0x15c   : > { %v1010_v46 = vpop.f32.mrb[3].mxu1 }
 0x161   : > { %v2501_v28 = vpop.f32.mrb[4].mxu1 }
 0x162   : > { %v1023_v52 = vpop.f32.mrb[5].mxu1 }
 0x163   : > { %v2502_v53 = vpop.f32.mrb[6].mxu1  ;;  %v2597_v21 = vpop.f32.mrb[4].mxu0 }
 0x164   : > { %v1026_v55 = vpop.f32.mrb[7].mxu1  ;;  %v2643_v17 = vadd.f32 %v2597_v21, %v2501_v28  ;;  %v1697_v24 = vpop.f32.mrb[5].mxu0 }
 0x165   : > { %v2645_v49 = vadd.f32 %v1697_v24, %v1023_v52  ;;  %v2598_v57 = vpop.f32.mrb[6].mxu0 }
 0x166   : > { %v2647_v63 = vadd.f32 %v2598_v57, %v2502_v53  ;;  %v1700_v14 = vpop.f32.mrb[7].mxu0 }
 0x167   : > { %v2649_v38 = vadd.f32 %v1700_v14, %v1026_v55 }
 0x179   : > { %v2621_v35 = vpop.f32.mrb[8].mxu1 }
 0x17a   : > { %v2644_v60 = vadd.f32 %v2643_v17, %v2621_v35  ;;  %v1859_v51 = vpop.f32.mrb[9].mxu1 }
 0x17b   : > { %v2646_v30 = vadd.f32 %v2645_v49, %v1859_v51  ;;  %v2622_v58 = vpop.f32.mrb[10].mxu1  ;;  %v2617_v8 = vpop.f32.mrb[0].mxu0 }
 0x17c   : > { %v1935_v47 = vadd.f32 %v2644_v60, %v2275_v11  ;;  %v2648_v22 = vadd.f32 %v2647_v63, %v2622_v58  ;;  %v1862_v5 = vpop.f32.mrb[11].mxu1  ;;  %v2639_v20 = vadd.f32 %v2617_v8, %v2497_v50  ;;  %v1843_v37 = vpop.f32.mrb[1].mxu0 }
 0x17d   : > { %v1933_v6 = vadd.f32 %v2646_v30, %v2275_v11  ;;  %v2650_v7 = vadd.f32 %v2649_v38, %v1862_v5  ;;  %v2640_v39 = vadd.f32 %v1843_v37, %v1007_v56  ;;  %v2618_v31 = vpop.f32.mrb[2].mxu0 }
 0x17e   : > { %v1943_v15 = vadd.f32 %v2294_v48, %v1935_v47  ;;  %v1936_v32 = vadd.f32 %v2648_v22, %v2275_v11  ;;  %v1931_v12 = vadd.f32 %v2639_v20, %v2275_v11  ;;  %v2641_v23 = vadd.f32 %v2618_v31, %v2498_v61  ;;  %v1846_v13 = vpop.f32.mrb[3].mxu0 }
 0x17f   : > { %v1941_v27 = vadd.f32 %v2290_v45, %v1933_v6  ;;  %v1934_v62 = vadd.f32 %v2650_v7, %v2275_v11  ;;  %v1929_v16 = vadd.f32 %v2640_v39, %v2275_v11  ;;  %v2642_v42 = vadd.f32 %v1846_v13, %v1010_v46 }
 0x180   : > { %v1951_v2 = vmax.f32 %v1943_v15, 0.0  ;;  %v1944_v59 = vadd.f32 %v2295_v4, %v1936_v32  ;;  %v1939_v44 = vadd.f32 %v2286_v9, %v1931_v12  ;;  %v1932_v26 = vadd.f32 %v2641_v23, %v2275_v11 }
 0x181   : > { %v1949_v18 = vmax.f32 %v1941_v27, 0.0  ;;  %v1942_v19 = vadd.f32 %v2291_v3, %v1934_v62  ;;  %v1937_v10 = vadd.f32 %v2282_v54, %v1929_v16  ;;  %v1930_v29 = vadd.f32 %v2642_v42, %v2275_v11 }
 0x182   : > { %1959 = vst [vmem:[%s3358_s5 + $0x30] sm:$0xff] %v1951_v2  ;;  %v1952_v34 = vmax.f32 %v1944_v59, 0.0  ;;  %v1947_v36 = vmax.f32 %v1939_v44, 0.0  ;;  %v1940_v50 = vadd.f32 %v2287_v40, %v1932_v26 }
 0x183   : > { %1957 = vst [vmem:[%s3358_s5 + $0x20] sm:$0xff] %v1949_v18  ;;  %v1950_v43 = vmax.f32 %v1942_v19, 0.0  ;;  %v1945_v56 = vmax.f32 %v1937_v10, 0.0  ;;  %v1938_v61 = vadd.f32 %v2283_v25, %v1930_v29 }
 0x184   : > { %1960 = vst [vmem:[%s3358_s5 + $0x38] sm:$0xff] %v1952_v34  ;;  %1955 = vst [vmem:[%s3358_s5 + $0x10] sm:$0xff] %v1947_v36  ;;  %v1948_v28 = vmax.f32 %v1940_v50, 0.0 }
 0x185   : > { %1958 = vst [vmem:[%s3358_s5 + $0x28] sm:$0xff] %v1950_v43  ;;  %1953 = vst [vmem:[%s3358_s5] sm:$0xff] %v1945_v56  ;;  %v1946_v46 = vmax.f32 %v1938_v61, 0.0 }
 0x186   : > { %1956 = vst [vmem:[%s3358_s5 + $0x18] sm:$0xff] %v1948_v28 }
 0x187   : > { %1954 = vst [vmem:[%s3358_s5 + $0x8] sm:$0xff] %v1946_v46 }
 0x188 PF: > { %s14_s15 = sadd.s32 1, %s2799_s15  }
 0x189   : > { %p11_p4 = scmp.ge.s32.totalorder %s14_s15, 4  }
 0x18b   :  { %13 = sbr.rel (!%p11_p4) target bundleno = 1 (0x1), region = 77 }

</bundles_post_ra>
